<compile_context>
chip_gen: v6e
topology: v6e:2x2x1
jax: 0.10.0
libtpu: 0.0.40
codegen_flags: <defaults>
</compile_context>

<pallas_src>
import functools

import numpy as np

import jax
import jax.numpy as jnp
from jax.experimental import pallas as pl
from jax.experimental.pallas import tpu as pltpu

_VMEM = pl.BlockSpec(memory_space=pltpu.MemorySpace.VMEM)

# ------------------------------ model config ---------------------------------

B = 2
IN_C = 4
HW = 16
NUM_CLASSES = 3
NUM_ANCHORS = 2
C0 = 8             # base[0] out channels
C1 = 16            # base[1] out channels   -> sources[0]
C2 = 16            # extras[0] out channels -> sources[1]
SRC_C = C1 + C2    # lane-packed two-source width
HIDDEN = 8         # att_fc1 hidden channels
PYR0 = 16          # pyramids[0] out channels
PYR1 = 16          # pyramids[1] out channels
HEAD_W = NUM_ANCHORS * 4 + NUM_ANCHORS * NUM_CLASSES   # fused loc|conf width (14)

_MXU_DTYPE = jnp.bfloat16   # MXU operand dtype; accumulation + elementwise stay f32
_WPAD = 32                  # every channel weight is zero-padded to [_WPAD, _WPAD]

# weight-slab entries / bias rows share the same ordering
(_W_BASE0, _W_BASE1, _W_EXTRA0, _W_FC1, _W_FC2,
 _W_SCONV, _W_PYR0, _W_PYR1, _W_HEAD0, _W_HEAD1) = range(10)
_NUM_BIAS = 10


# --------------------- trace-time (numpy) spatial operators -------------------


def _round_up(x, m):
    return (x + m - 1) // m * m


def _bilinear_matrix_np(out_size, in_size):
    """1-D bilinear interpolation matrix, align_corners=True (legacy F.upsample)."""
    mat = np.zeros((out_size, in_size), np.float64)
    if in_size == 1 or out_size == 1:
        mat[:, 0] = 1.0
        return mat.astype(np.float32)
    src = np.arange(out_size, dtype=np.float64) * (in_size - 1) / (out_size - 1)
    i0 = np.clip(np.floor(src).astype(np.int64), 0, in_size - 1)
    i1 = np.clip(i0 + 1, 0, in_size - 1)
    w1 = src - i0
    w0 = 1.0 - w1
    rows = np.arange(out_size)
    np.add.at(mat, (rows, i0), w0)
    np.add.at(mat, (rows, i1), w1)
    return mat.astype(np.float32)


def _spatial_ops_np(h0, w0):
    """Per-batch spatial operators (NOT kron'd over batch)."""
    h1, w1 = h0 // 2, w0 // 2
    sub = np.zeros((h1 * w1, h0 * w0), np.float32)     # even-pixel selection
    for i in range(h1):
        for j in range(w1):
            sub[i * w1 + j, (2 * i) * w0 + (2 * j)] = 1.0
    # TODO(synk): at real resolutions use the separable 1-D interpolators instead
    # of this dense kron (O((H*W)^2) memory) and a strided slice instead of `sub`.
    up = np.kron(_bilinear_matrix_np(h0, h1),
                 _bilinear_matrix_np(w0, w1)).astype(np.float32)
    return sub, up


def _const_layout(n0p, n1p):
    """Row offsets inside the single f32 const slab."""
    lay = {"sub": 0}
    lay["up"] = _round_up(n1p, 8)
    lay["pool"] = lay["up"] + _round_up(n0p, 8)
    lay["bias"] = lay["pool"] + 8
    lay["m0"] = lay["bias"] + _NUM_BIAS
    lay["m1"] = lay["m0"] + 1
    lay["rows"] = lay["m1"] + 1
    lay["width"] = max(n0p, SRC_C)
    return lay


# ------------------------------ wrapper-side packing --------------------------


def _pack_weights(params, phase):
    """One bf16 slab [n_w, 32, 32]; each weight zero-padded / lane-shifted so the
    two sources stay lane-concatenated (src0 -> lanes 0:16, src1 -> lanes 16:32)."""

    def pad_w(w, roff=0, coff=0):
        r, c = w.shape
        return jnp.pad(w, ((roff, _WPAD - roff - r), (coff, _WPAD - coff - c)))

    w_list = [
        pad_w(params["base0_w"]),
        pad_w(params["base1_w"]),                     # src0 -> lanes 0:16
        pad_w(params["extra0_w"], coff=C1),           # src0 lanes -> src1 in lanes 16:32
        pad_w(params["fc1_w"]),
        pad_w(params["fc2_w"]),
        pad_w(params["sconv0_w"])
        + pad_w(params["sconv1_w"], roff=C1, coff=C1),            # block-diag sconv
        pad_w(params["pyr0_w"]),
        pad_w(params["pyr1_w"]),
    ]
    if phase != "feature":                            # feature phase: no head weights at all
        w_list += [
            pad_w(jnp.concatenate([params["loc0_w"], params["conf0_w"]], axis=1)),
            pad_w(jnp.concatenate([params["loc1_w"], params["conf1_w"]], axis=1)),
        ]
    return jnp.stack(w_list).astype(_MXU_DTYPE)


def _pack_consts(params, h0, w0):
    """One f32 slab holding spatial operators, all biases and the mixture lanes."""
    n0p, n1p = h0 * w0, (h0 // 2) * (w0 // 2)
    lay = _const_layout(n0p, n1p)
    width = lay["width"]

    sub, up = _spatial_ops_np(h0, w0)
    base = np.zeros((lay["bias"], width), np.float32)
    base[lay["sub"]:lay["sub"] + n1p, :n0p] = sub
    base[lay["up"]:lay["up"] + n0p, :n1p] = up
    base[lay["pool"], :n0p] = 1.0 / n0p               # global-avg-pool row

    def row(vec, off=0):
        r = jnp.zeros((width,), jnp.float32)
        return r.at[off:off + vec.shape[0]].set(vec)

    # parameter-only 2-way mixture softmax: computed in the wrapper, shipped as lanes
    mix0 = jax.nn.softmax(params["wblock0"])
    mix1 = jax.nn.softmax(params["wblock1"])
    m0 = jnp.concatenate([jnp.broadcast_to(mix0[0], (C1,)),
                          jnp.broadcast_to(mix1[0], (C2,))])
    m1 = jnp.concatenate([jnp.broadcast_to(mix0[1], (C1,)),
                          jnp.broadcast_to(mix1[1], (C2,))])

    rows = [
        row(params["base0_b"]),
        row(params["base1_b"]),                        # lanes 0:16; padded lanes stay 0
        row(params["extra0_b"], off=C1),               # lanes 16:32
        row(params["fc1_b"]),
        row(params["fc2_b"]),
        row(jnp.concatenate([params["sconv0_b"], params["sconv1_b"]])),
        row(params["pyr0_b"]),
        row(params["pyr1_b"]),
        row(jnp.concatenate([params["loc0_b"], params["conf0_b"]])),
        row(jnp.concatenate([params["loc1_b"], params["conf1_b"]])),
        row(m0),
        row(m1),
    ]
    c_slab = jnp.concatenate([jnp.asarray(base), jnp.stack(rows)], axis=0)
    return c_slab, lay


# ------------------------------ fused Pallas kernel ---------------------------


def _fused_forward_kernel(x_ref, w_ref, c_ref, o0_ref, o1_ref, *,
                          phase, batch, n0p, n1p, lay):
    f32 = jnp.float32

    def weight(i, cin, cout):
        return w_ref[i, :cin, :cout]                   # bf16 (pre-cast in wrapper)

    def bias(i, cout):
        r = lay["bias"] + i
        return c_ref[r:r + 1, :cout]                   # [1, cout] f32

    def cmm(a, i, cin, cout, relu=False):
        # 1x1-conv channel matmul: bf16 MXU operands, f32 accumulate + f32 epilogue.
        acc = jnp.dot(a.astype(_MXU_DTYPE), weight(i, cin, cout),
                      preferred_element_type=f32)
        acc = acc + bias(i, cout)
        if relu:
            acc = jnp.maximum(acc, 0.0)
        return acc

    def smm(op, a):
        # spatial-operator matmuls stay f32 (accuracy; tiny at these sizes)
        return jnp.dot(op, a, preferred_element_type=f32)

    def per_batch(fn):
        # static batch loop; every part is sublane-aligned so the concat is trivial
        return jnp.concatenate([fn(b) for b in range(batch)], axis=0)

    sub_m = c_ref[lay["sub"]:lay["sub"] + n1p, :n0p]   # [n1p, n0p] even-pixel select
    up_m = c_ref[lay["up"]:lay["up"] + n0p, :n1p]      # [n0p, n1p] bilinear up
    pool_r = c_ref[lay["pool"]:lay["pool"] + 1, :n0p]  # [1, n0p]   global avg pool
    m0 = c_ref[lay["m0"]:lay["m0"] + 1, :SRC_C]        # [1, 32]    mixture[0] lanes
    m1 = c_ref[lay["m1"]:lay["m1"] + 1, :SRC_C]        # [1, 32]    mixture[1] lanes

    # ---- base: two 1x1 convs on the full flattened slab ----------------------
    a0 = cmm(x_ref[...], _W_BASE0, IN_C, C0, relu=True)           # [B*n0p, C0]
    src0 = cmm(a0, _W_BASE1, C0, SRC_C, relu=True)                # src0 in lanes 0:16

    # ---- extras (stride-2) + bilinear upsample, per batch --------------------
    def up_branch(b):
        s0 = src0[b * n0p:(b + 1) * n0p, :]
        low = smm(sub_m, s0)                                      # even-pixel subsample
        s1 = cmm(low, _W_EXTRA0, SRC_C, SRC_C, relu=True)         # src1 in lanes 16:32
        return smm(up_m, s1)                                      # bilinear up to n0p

    packed = src0 + per_batch(up_branch)                          # src0 || up(src1)

    # ---- SE attention: global-avg-pool + fc1/fc2 per batch --------------------
    def se_branch(b):
        pooled = smm(pool_r, packed[b * n0p:(b + 1) * n0p, :])    # [1, 32]
        h = cmm(pooled, _W_FC1, SRC_C, HIDDEN, relu=True)
        f2 = cmm(h, _W_FC2, HIDDEN, SRC_C)                        # [1, 32]
        return jnp.broadcast_to(f2, (n0p, SRC_C))

    fc_pix = per_batch(se_branch)                                 # [B*n0p, 32]

    sconv = cmm(packed, _W_SCONV, SRC_C, SRC_C)                   # block-diag sconv0|sconv1
    gate = jax.nn.sigmoid(sconv * m0 + fc_pix * m1)               # f32 elementwise
    att = packed * gate                                           # att0 || att1

    # ---- pyramids --------------------------------------------------------------
    p0 = cmm(att, _W_PYR0, SRC_C, PYR0, relu=True)                # [B*n0p, PYR0]

    def pyr1_branch(b):
        low = smm(sub_m, p0[b * n0p:(b + 1) * n0p, :])
        return cmm(low, _W_PYR1, PYR0, PYR1, relu=True)

    p1 = per_batch(pyr1_branch)                                   # [B*n1p, PYR1]

    if phase == "feature":
        o0_ref[...] = p0
        o1_ref[...] = p1
        return

    # ---- fused loc|conf heads: one matmul + one full-width store per level ----
    n_loc = NUM_ANCHORS * 4

    def head(feat, wi, cin, out_ref):
        logits = cmm(feat, wi, cin, HEAD_W)                       # loc 0:8 | conf 8:14
        if phase != "eval":
            out_ref[...] = logits
            return
        lane = jax.lax.broadcasted_iota(jnp.int32, (1, HEAD_W), 1)
        is_loc = lane < n_loc
        zeros = jnp.zeros_like(logits)
        # per-anchor-group class softmax with PER-GROUP max (robust: no cross-group
        # underflow -> NaN), assembled with lane masks so there is a single store.
        shift = jnp.where(is_loc, logits, zeros)
        denom = jnp.where(is_loc, jnp.ones_like(logits), zeros)
        for a in range(NUM_ANCHORS):
            grp = ((lane >= n_loc + a * NUM_CLASSES)
                   & (lane < n_loc + (a + 1) * NUM_CLASSES))
            m_a = jnp.max(jnp.where(grp, logits, -jnp.inf), axis=-1, keepdims=True)
            shift = jnp.where(grp, m_a, shift)
        e = jnp.exp(logits - shift)                               # loc lanes -> 1.0
        for a in range(NUM_ANCHORS):
            grp = ((lane >= n_loc + a * NUM_CLASSES)
                   & (lane < n_loc + (a + 1) * NUM_CLASSES))
            s_a = jnp.sum(jnp.where(grp, e, zeros), axis=-1, keepdims=True)
            denom = jnp.where(grp, s_a, denom)
        out_ref[...] = jnp.where(is_loc, logits, e / denom)

    head(p0, _W_HEAD0, PYR0, o0_ref)
    head(p1, _W_HEAD1, PYR1, o1_ref)


def _run_fused(x_slab, w_slab, c_slab, lay, phase, batch, n0p, n1p):
    f32 = jnp.float32
    if phase == "feature":
        out_shape = (jax.ShapeDtypeStruct((batch * n0p, PYR0), f32),
                     jax.ShapeDtypeStruct((batch * n1p, PYR1), f32))
    else:
        out_shape = (jax.ShapeDtypeStruct((batch * n0p, HEAD_W), f32),
                     jax.ShapeDtypeStruct((batch * n1p, HEAD_W), f32))
    kernel = functools.partial(_fused_forward_kernel, phase=phase, batch=batch,
                               n0p=n0p, n1p=n1p, lay=lay)
    # TODO(synk): at real SSD resolutions add a pixel-row grid with
    # dimension_semantics=("parallel",) and per-generation vmem_limit_bytes
    # (v7x: 64 MiB physical) so both TensorCores and DMA double-buffering are used.
    return pl.pallas_call(
        kernel,
        out_shape=out_shape,
        in_specs=[_VMEM, _VMEM, _VMEM],
        out_specs=tuple(_VMEM for _ in out_shape),
    )(x_slab, w_slab, c_slab)


# ------------------------------ params / forward ------------------------------


def init_params(key):
    def conv_p(k, cin, cout, scale=0.1):
        kw, kb = jax.random.split(k)
        return (jax.random.normal(kw, (cin, cout), jnp.float32) * scale,
                jax.random.normal(kb, (cout,), jnp.float32) * scale)

    keys = jax.random.split(key, 16)
    p = {}
    p["base0_w"], p["base0_b"] = conv_p(keys[0], IN_C, C0)
    p["base1_w"], p["base1_b"] = conv_p(keys[1], C0, C1)
    p["extra0_w"], p["extra0_b"] = conv_p(keys[2], C1, C2)
    p["fc1_w"], p["fc1_b"] = conv_p(keys[3], C1 + C2, HIDDEN)
    p["fc2_w"], p["fc2_b"] = conv_p(keys[4], HIDDEN, C1 + C2)
    p["sconv0_w"], p["sconv0_b"] = conv_p(keys[5], C1, C1)
    p["sconv1_w"], p["sconv1_b"] = conv_p(keys[6], C2, C2)
    p["wblock0"] = jax.random.normal(keys[7], (2,), jnp.float32)
    p["wblock1"] = jax.random.normal(keys[8], (2,), jnp.float32)
    p["pyr0_w"], p["pyr0_b"] = conv_p(keys[9], C1 + C2, PYR0)
    p["pyr1_w"], p["pyr1_b"] = conv_p(keys[10], PYR0, PYR1)
    p["loc0_w"], p["loc0_b"] = conv_p(keys[11], PYR0, NUM_ANCHORS * 4)
    p["loc1_w"], p["loc1_b"] = conv_p(keys[12], PYR1, NUM_ANCHORS * 4)
    p["conf0_w"], p["conf0_b"] = conv_p(keys[13], PYR0, NUM_ANCHORS * NUM_CLASSES)
    p["conf1_w"], p["conf1_b"] = conv_p(keys[14], PYR1, NUM_ANCHORS * NUM_CLASSES)
    return p


def forward(params, x, phase="eval"):
    assert phase in ("eval", "train", "feature")
    b, cin, hh, ww = x.shape
    h0, w0 = hh // 2, ww // 2
    n0p, n1p = h0 * w0, (h0 // 2) * (w0 // 2)
    # base[0] is a stride-2 1x1 conv: its even-pixel subsample is fused with the
    # single NCHW->NHWC boundary conversion.
    # TODO(synk): at real resolutions fold this slice+transpose into the Pallas
    # boundary to save one full-input HBM round trip.
    x_slab = jnp.transpose(x[:, :, ::2, ::2], (0, 2, 3, 1)).reshape(b * n0p, cin)
    w_slab = _pack_weights(params, phase)
    c_slab, lay = _pack_consts(params, h0, w0)

    outs = _run_fused(x_slab, w_slab, c_slab, lay, phase, b, n0p, n1p)

    if phase == "feature":
        p0, p1 = outs
        h1, w1 = h0 // 2, w0 // 2
        return [jnp.transpose(p0.reshape(b, h0, w0, PYR0), (0, 3, 1, 2)),
                jnp.transpose(p1.reshape(b, h1, w1, PYR1), (0, 3, 1, 2))]

    out0, out1 = outs
    n_loc = NUM_ANCHORS * 4
    # boundary assembly only (pure reshapes/concats on ~10 KiB of outputs)
    loc = jnp.concatenate([out0[:, :n_loc].reshape(b, -1),
                           out1[:, :n_loc].reshape(b, -1)], axis=1)
    conf = jnp.concatenate([out0[:, n_loc:].reshape(b, -1),
                            out1[:, n_loc:].reshape(b, -1)], axis=1)
    loc_out = loc.reshape(b, -1, 4)
    if phase == "eval":
        conf_out = conf.reshape(-1, NUM_CLASSES)   # softmax already applied in-kernel
    else:
        conf_out = conf.reshape(b, -1, NUM_CLASSES)
    return loc_out, conf_out


if __name__ == "__main__":
    key = jax.random.PRNGKey(0)
    pkey, xkey = jax.random.split(key)
    params = init_params(pkey)
    x = jax.random.normal(xkey, (B, IN_C, HW, HW), jnp.float32)

    loc, conf = jax.jit(forward)(params, x)
    jax.block_until_ready((loc, conf))

    # num_priors = 8*8*NUM_ANCHORS + 4*4*NUM_ANCHORS = 160
    assert loc.shape == (B, 160, 4), loc.shape
    assert conf.shape == (B * 160, NUM_CLASSES), conf.shape
    assert bool(jnp.all(jnp.isfinite(loc))) and bool(jnp.all(jnp.isfinite(conf)))
    assert bool(jnp.allclose(jnp.sum(conf, axis=-1), 1.0, atol=1e-5))
    print("KERNEL_OK")
</pallas_src>

<mosaic_0001>
module attributes {stable_mosaic.version = 11 : i64} {
  func.func @_fused_forward_kernel(%arg0: memref<128x4xf32, #tpu.memory_space<vmem>>, %arg1: memref<10x32x32xbf16, #tpu.memory_space<vmem>>, %arg2: memref<100x64xf32, #tpu.memory_space<vmem>>, %arg3: memref<128x14xf32, #tpu.memory_space<vmem>>, %arg4: memref<32x14xf32, #tpu.memory_space<vmem>>) attributes {dimension_semantics = [], scalar_prefetch = 0 : i64, scratch_operands = 0 : i64, tpu.core_type = #tpu.core_type<tc>} {
    %c0 = arith.constant 0 : index
    %c0_0 = arith.constant 0 : index
    %0 = vector.load %arg2[%c0, %c0_0] : memref<100x64xf32, #tpu.memory_space<vmem>>, vector<16x64xf32>
    %c16 = arith.constant 16 : index
    %c0_1 = arith.constant 0 : index
    %1 = vector.load %arg2[%c16, %c0_1] : memref<100x64xf32, #tpu.memory_space<vmem>>, vector<64x16xf32>
    %c80 = arith.constant 80 : index
    %c0_2 = arith.constant 0 : index
    %2 = vector.load %arg2[%c80, %c0_2] : memref<100x64xf32, #tpu.memory_space<vmem>>, vector<1x64xf32>
    %c98 = arith.constant 98 : index
    %c0_3 = arith.constant 0 : index
    %3 = vector.load %arg2[%c98, %c0_3] : memref<100x64xf32, #tpu.memory_space<vmem>>, vector<1x32xf32>
    %c99 = arith.constant 99 : index
    %c0_4 = arith.constant 0 : index
    %4 = vector.load %arg2[%c99, %c0_4] : memref<100x64xf32, #tpu.memory_space<vmem>>, vector<1x32xf32>
    %c0_5 = arith.constant 0 : index
    %c0_6 = arith.constant 0 : index
    %5 = vector.load %arg0[%c0_5, %c0_6] : memref<128x4xf32, #tpu.memory_space<vmem>>, vector<128x4xf32>
    %6 = arith.truncf %5 : vector<128x4xf32> to vector<128x4xbf16>
    %c0_7 = arith.constant 0 : index
    %c0_8 = arith.constant 0 : index
    %c0_9 = arith.constant 0 : index
    %7 = vector.load %arg1[%c0_7, %c0_8, %c0_9] : memref<10x32x32xbf16, #tpu.memory_space<vmem>>, vector<1x4x8xbf16>
    %8 = vector.shape_cast %7 : vector<1x4x8xbf16> to vector<4x8xbf16>
    %cst = arith.constant dense<0.000000e+00> : vector<128x8xf32>
    %9 = tpu.matmul %6, %8, %cst {dimension_numbers = #tpu.dot_dimension_numbers<[1], [0], [0], [1], [0, 0, 1, 1], [], []>} : vector<128x4xbf16>, vector<4x8xbf16>, vector<128x8xf32> -> vector<128x8xf32>
    %c88 = arith.constant 88 : index
    %c0_10 = arith.constant 0 : index
    %10 = vector.load %arg2[%c88, %c0_10] : memref<100x64xf32, #tpu.memory_space<vmem>>, vector<1x8xf32>
    %11 = vector.broadcast %10 : vector<1x8xf32> to vector<128x8xf32>
    %12 = arith.addf %9, %11 : vector<128x8xf32>
    %cst_11 = arith.constant 0.000000e+00 : f32
    %13 = vector.broadcast %cst_11 : f32 to vector<128x8xf32>
    %14 = arith.maximumf %12, %13 : vector<128x8xf32>
    %15 = arith.truncf %14 : vector<128x8xf32> to vector<128x8xbf16>
    %c1 = arith.constant 1 : index
    %c0_12 = arith.constant 0 : index
    %c0_13 = arith.constant 0 : index
    %16 = vector.load %arg1[%c1, %c0_12, %c0_13] : memref<10x32x32xbf16, #tpu.memory_space<vmem>>, vector<1x8x32xbf16>
    %17 = vector.shape_cast %16 : vector<1x8x32xbf16> to vector<8x32xbf16>
    %cst_14 = arith.constant dense<0.000000e+00> : vector<128x32xf32>
    %18 = tpu.matmul %15, %17, %cst_14 {dimension_numbers = #tpu.dot_dimension_numbers<[1], [0], [0], [1], [0, 0, 1, 1], [], []>} : vector<128x8xbf16>, vector<8x32xbf16>, vector<128x32xf32> -> vector<128x32xf32>
    %c89 = arith.constant 89 : index
    %c0_15 = arith.constant 0 : index
    %19 = vector.load %arg2[%c89, %c0_15] : memref<100x64xf32, #tpu.memory_space<vmem>>, vector<1x32xf32>
    %20 = vector.broadcast %19 : vector<1x32xf32> to vector<128x32xf32>
    %21 = arith.addf %18, %20 : vector<128x32xf32>
    %cst_16 = arith.constant 0.000000e+00 : f32
    %22 = vector.broadcast %cst_16 : f32 to vector<128x32xf32>
    %23 = arith.maximumf %21, %22 : vector<128x32xf32>
    %24 = vector.extract_strided_slice %23 {offsets = [0, 0], sizes = [64, 32], strides = [1, 1]} : vector<128x32xf32> to vector<64x32xf32>
    %cst_17 = arith.constant dense<0.000000e+00> : vector<16x32xf32>
    %25 = tpu.matmul %0, %24, %cst_17 {dimension_numbers = #tpu.dot_dimension_numbers<[1], [0], [0], [1], [0, 0, 1, 1], [], []>} : vector<16x64xf32>, vector<64x32xf32>, vector<16x32xf32> -> vector<16x32xf32>
    %26 = arith.truncf %25 : vector<16x32xf32> to vector<16x32xbf16>
    %c2 = arith.constant 2 : index
    %c0_18 = arith.constant 0 : index
    %c0_19 = arith.constant 0 : index
    %27 = vector.load %arg1[%c2, %c0_18, %c0_19] : memref<10x32x32xbf16, #tpu.memory_space<vmem>>, vector<1x32x32xbf16>
    %28 = vector.shape_cast %27 : vector<1x32x32xbf16> to vector<32x32xbf16>
    %cst_20 = arith.constant dense<0.000000e+00> : vector<16x32xf32>
    %29 = tpu.matmul %26, %28, %cst_20 {dimension_numbers = #tpu.dot_dimension_numbers<[1], [0], [0], [1], [0, 0, 1, 1], [], []>} : vector<16x32xbf16>, vector<32x32xbf16>, vector<16x32xf32> -> vector<16x32xf32>
    %c90 = arith.constant 90 : index
    %c0_21 = arith.constant 0 : index
    %30 = vector.load %arg2[%c90, %c0_21] : memref<100x64xf32, #tpu.memory_space<vmem>>, vector<1x32xf32>
    %31 = vector.broadcast %30 : vector<1x32xf32> to vector<16x32xf32>
    %32 = arith.addf %29, %31 : vector<16x32xf32>
    %cst_22 = arith.constant 0.000000e+00 : f32
    %33 = vector.broadcast %cst_22 : f32 to vector<16x32xf32>
    %34 = arith.maximumf %32, %33 : vector<16x32xf32>
    %cst_23 = arith.constant dense<0.000000e+00> : vector<64x32xf32>
    %35 = tpu.matmul %1, %34, %cst_23 {dimension_numbers = #tpu.dot_dimension_numbers<[1], [0], [0], [1], [0, 0, 1, 1], [], []>} : vector<64x16xf32>, vector<16x32xf32>, vector<64x32xf32> -> vector<64x32xf32>
    %36 = vector.extract_strided_slice %23 {offsets = [64, 0], sizes = [64, 32], strides = [1, 1]} : vector<128x32xf32> to vector<64x32xf32>
    %cst_24 = arith.constant dense<0.000000e+00> : vector<16x32xf32>
    %37 = tpu.matmul %0, %36, %cst_24 {dimension_numbers = #tpu.dot_dimension_numbers<[1], [0], [0], [1], [0, 0, 1, 1], [], []>} : vector<16x64xf32>, vector<64x32xf32>, vector<16x32xf32> -> vector<16x32xf32>
    %38 = arith.truncf %37 : vector<16x32xf32> to vector<16x32xbf16>
    %c2_25 = arith.constant 2 : index
    %c0_26 = arith.constant 0 : index
    %c0_27 = arith.constant 0 : index
    %39 = vector.load %arg1[%c2_25, %c0_26, %c0_27] : memref<10x32x32xbf16, #tpu.memory_space<vmem>>, vector<1x32x32xbf16>
    %40 = vector.shape_cast %39 : vector<1x32x32xbf16> to vector<32x32xbf16>
    %cst_28 = arith.constant dense<0.000000e+00> : vector<16x32xf32>
    %41 = tpu.matmul %38, %40, %cst_28 {dimension_numbers = #tpu.dot_dimension_numbers<[1], [0], [0], [1], [0, 0, 1, 1], [], []>} : vector<16x32xbf16>, vector<32x32xbf16>, vector<16x32xf32> -> vector<16x32xf32>
    %c90_29 = arith.constant 90 : index
    %c0_30 = arith.constant 0 : index
    %42 = vector.load %arg2[%c90_29, %c0_30] : memref<100x64xf32, #tpu.memory_space<vmem>>, vector<1x32xf32>
    %43 = vector.broadcast %42 : vector<1x32xf32> to vector<16x32xf32>
    %44 = arith.addf %41, %43 : vector<16x32xf32>
    %cst_31 = arith.constant 0.000000e+00 : f32
    %45 = vector.broadcast %cst_31 : f32 to vector<16x32xf32>
    %46 = arith.maximumf %44, %45 : vector<16x32xf32>
    %cst_32 = arith.constant dense<0.000000e+00> : vector<64x32xf32>
    %47 = tpu.matmul %1, %46, %cst_32 {dimension_numbers = #tpu.dot_dimension_numbers<[1], [0], [0], [1], [0, 0, 1, 1], [], []>} : vector<64x16xf32>, vector<16x32xf32>, vector<64x32xf32> -> vector<64x32xf32>
    %48 = tpu.concatenate %35, %47 in 0 : vector<64x32xf32>, vector<64x32xf32> -> vector<128x32xf32>
    %49 = arith.addf %23, %48 : vector<128x32xf32>
    %50 = vector.extract_strided_slice %49 {offsets = [0, 0], sizes = [64, 32], strides = [1, 1]} : vector<128x32xf32> to vector<64x32xf32>
    %cst_33 = arith.constant dense<0.000000e+00> : vector<1x32xf32>
    %51 = tpu.matmul %2, %50, %cst_33 {dimension_numbers = #tpu.dot_dimension_numbers<[1], [0], [0], [1], [0, 0, 1, 1], [], []>} : vector<1x64xf32>, vector<64x32xf32>, vector<1x32xf32> -> vector<1x32xf32>
    %52 = arith.truncf %51 : vector<1x32xf32> to vector<1x32xbf16>
    %c3 = arith.constant 3 : index
    %c0_34 = arith.constant 0 : index
    %c0_35 = arith.constant 0 : index
    %53 = vector.load %arg1[%c3, %c0_34, %c0_35] : memref<10x32x32xbf16, #tpu.memory_space<vmem>>, vector<1x32x8xbf16>
    %54 = vector.shape_cast %53 : vector<1x32x8xbf16> to vector<32x8xbf16>
    %cst_36 = arith.constant dense<0.000000e+00> : vector<1x8xf32>
    %55 = tpu.matmul %52, %54, %cst_36 {dimension_numbers = #tpu.dot_dimension_numbers<[1], [0], [0], [1], [0, 0, 1, 1], [], []>} : vector<1x32xbf16>, vector<32x8xbf16>, vector<1x8xf32> -> vector<1x8xf32>
    %c91 = arith.constant 91 : index
    %c0_37 = arith.constant 0 : index
    %56 = vector.load %arg2[%c91, %c0_37] : memref<100x64xf32, #tpu.memory_space<vmem>>, vector<1x8xf32>
    %57 = arith.addf %55, %56 : vector<1x8xf32>
    %cst_38 = arith.constant 0.000000e+00 : f32
    %58 = vector.broadcast %cst_38 : f32 to vector<1x8xf32>
    %59 = arith.maximumf %57, %58 : vector<1x8xf32>
    %60 = arith.truncf %59 : vector<1x8xf32> to vector<1x8xbf16>
    %c4 = arith.constant 4 : index
    %c0_39 = arith.constant 0 : index
    %c0_40 = arith.constant 0 : index
    %61 = vector.load %arg1[%c4, %c0_39, %c0_40] : memref<10x32x32xbf16, #tpu.memory_space<vmem>>, vector<1x8x32xbf16>
    %62 = vector.shape_cast %61 : vector<1x8x32xbf16> to vector<8x32xbf16>
    %cst_41 = arith.constant dense<0.000000e+00> : vector<1x32xf32>
    %63 = tpu.matmul %60, %62, %cst_41 {dimension_numbers = #tpu.dot_dimension_numbers<[1], [0], [0], [1], [0, 0, 1, 1], [], []>} : vector<1x8xbf16>, vector<8x32xbf16>, vector<1x32xf32> -> vector<1x32xf32>
    %c92 = arith.constant 92 : index
    %c0_42 = arith.constant 0 : index
    %64 = vector.load %arg2[%c92, %c0_42] : memref<100x64xf32, #tpu.memory_space<vmem>>, vector<1x32xf32>
    %65 = arith.addf %63, %64 : vector<1x32xf32>
    %66 = vector.shape_cast %65 : vector<1x32xf32> to vector<1x32xf32>
    %67 = vector.broadcast %66 : vector<1x32xf32> to vector<64x32xf32>
    %68 = vector.extract_strided_slice %49 {offsets = [64, 0], sizes = [64, 32], strides = [1, 1]} : vector<128x32xf32> to vector<64x32xf32>
    %cst_43 = arith.constant dense<0.000000e+00> : vector<1x32xf32>
    %69 = tpu.matmul %2, %68, %cst_43 {dimension_numbers = #tpu.dot_dimension_numbers<[1], [0], [0], [1], [0, 0, 1, 1], [], []>} : vector<1x64xf32>, vector<64x32xf32>, vector<1x32xf32> -> vector<1x32xf32>
    %70 = arith.truncf %69 : vector<1x32xf32> to vector<1x32xbf16>
    %c3_44 = arith.constant 3 : index
    %c0_45 = arith.constant 0 : index
    %c0_46 = arith.constant 0 : index
    %71 = vector.load %arg1[%c3_44, %c0_45, %c0_46] : memref<10x32x32xbf16, #tpu.memory_space<vmem>>, vector<1x32x8xbf16>
    %72 = vector.shape_cast %71 : vector<1x32x8xbf16> to vector<32x8xbf16>
    %cst_47 = arith.constant dense<0.000000e+00> : vector<1x8xf32>
    %73 = tpu.matmul %70, %72, %cst_47 {dimension_numbers = #tpu.dot_dimension_numbers<[1], [0], [0], [1], [0, 0, 1, 1], [], []>} : vector<1x32xbf16>, vector<32x8xbf16>, vector<1x8xf32> -> vector<1x8xf32>
    %c91_48 = arith.constant 91 : index
    %c0_49 = arith.constant 0 : index
    %74 = vector.load %arg2[%c91_48, %c0_49] : memref<100x64xf32, #tpu.memory_space<vmem>>, vector<1x8xf32>
    %75 = arith.addf %73, %74 : vector<1x8xf32>
    %cst_50 = arith.constant 0.000000e+00 : f32
    %76 = vector.broadcast %cst_50 : f32 to vector<1x8xf32>
    %77 = arith.maximumf %75, %76 : vector<1x8xf32>
    %78 = arith.truncf %77 : vector<1x8xf32> to vector<1x8xbf16>
    %c4_51 = arith.constant 4 : index
    %c0_52 = arith.constant 0 : index
    %c0_53 = arith.constant 0 : index
    %79 = vector.load %arg1[%c4_51, %c0_52, %c0_53] : memref<10x32x32xbf16, #tpu.memory_space<vmem>>, vector<1x8x32xbf16>
    %80 = vector.shape_cast %79 : vector<1x8x32xbf16> to vector<8x32xbf16>
    %cst_54 = arith.constant dense<0.000000e+00> : vector<1x32xf32>
    %81 = tpu.matmul %78, %80, %cst_54 {dimension_numbers = #tpu.dot_dimension_numbers<[1], [0], [0], [1], [0, 0, 1, 1], [], []>} : vector<1x8xbf16>, vector<8x32xbf16>, vector<1x32xf32> -> vector<1x32xf32>
    %c92_55 = arith.constant 92 : index
    %c0_56 = arith.constant 0 : index
    %82 = vector.load %arg2[%c92_55, %c0_56] : memref<100x64xf32, #tpu.memory_space<vmem>>, vector<1x32xf32>
    %83 = arith.addf %81, %82 : vector<1x32xf32>
    %84 = vector.shape_cast %83 : vector<1x32xf32> to vector<1x32xf32>
    %85 = vector.broadcast %84 : vector<1x32xf32> to vector<64x32xf32>
    %86 = tpu.concatenate %67, %85 in 0 : vector<64x32xf32>, vector<64x32xf32> -> vector<128x32xf32>
    %87 = arith.truncf %49 : vector<128x32xf32> to vector<128x32xbf16>
    %c5 = arith.constant 5 : index
    %c0_57 = arith.constant 0 : index
    %c0_58 = arith.constant 0 : index
    %88 = vector.load %arg1[%c5, %c0_57, %c0_58] : memref<10x32x32xbf16, #tpu.memory_space<vmem>>, vector<1x32x32xbf16>
    %89 = vector.shape_cast %88 : vector<1x32x32xbf16> to vector<32x32xbf16>
    %cst_59 = arith.constant dense<0.000000e+00> : vector<128x32xf32>
    %90 = tpu.matmul %87, %89, %cst_59 {dimension_numbers = #tpu.dot_dimension_numbers<[1], [0], [0], [1], [0, 0, 1, 1], [], []>} : vector<128x32xbf16>, vector<32x32xbf16>, vector<128x32xf32> -> vector<128x32xf32>
    %c93 = arith.constant 93 : index
    %c0_60 = arith.constant 0 : index
    %91 = vector.load %arg2[%c93, %c0_60] : memref<100x64xf32, #tpu.memory_space<vmem>>, vector<1x32xf32>
    %92 = vector.broadcast %91 : vector<1x32xf32> to vector<128x32xf32>
    %93 = arith.addf %90, %92 : vector<128x32xf32>
    %94 = vector.broadcast %3 : vector<1x32xf32> to vector<128x32xf32>
    %95 = arith.mulf %93, %94 : vector<128x32xf32>
    %96 = vector.broadcast %4 : vector<1x32xf32> to vector<128x32xf32>
    %97 = arith.mulf %86, %96 : vector<128x32xf32>
    %98 = arith.addf %95, %97 : vector<128x32xf32>
    %99 = arith.negf %98 : vector<128x32xf32>
    %100 = math.exp %99 : vector<128x32xf32>
    %cst_61 = arith.constant 1.000000e+00 : f32
    %101 = vector.broadcast %cst_61 : f32 to vector<128x32xf32>
    %102 = arith.addf %101, %100 : vector<128x32xf32>
    %103 = arith.divf %101, %102 : vector<128x32xf32>
    %104 = arith.mulf %49, %103 : vector<128x32xf32>
    %105 = arith.truncf %104 : vector<128x32xf32> to vector<128x32xbf16>
    %c6 = arith.constant 6 : index
    %c0_62 = arith.constant 0 : index
    %c0_63 = arith.constant 0 : index
    %106 = vector.load %arg1[%c6, %c0_62, %c0_63] : memref<10x32x32xbf16, #tpu.memory_space<vmem>>, vector<1x32x16xbf16>
    %107 = vector.shape_cast %106 : vector<1x32x16xbf16> to vector<32x16xbf16>
    %cst_64 = arith.constant dense<0.000000e+00> : vector<128x16xf32>
    %108 = tpu.matmul %105, %107, %cst_64 {dimension_numbers = #tpu.dot_dimension_numbers<[1], [0], [0], [1], [0, 0, 1, 1], [], []>} : vector<128x32xbf16>, vector<32x16xbf16>, vector<128x16xf32> -> vector<128x16xf32>
    %c94 = arith.constant 94 : index
    %c0_65 = arith.constant 0 : index
    %109 = vector.load %arg2[%c94, %c0_65] : memref<100x64xf32, #tpu.memory_space<vmem>>, vector<1x16xf32>
    %110 = vector.broadcast %109 : vector<1x16xf32> to vector<128x16xf32>
    %111 = arith.addf %108, %110 : vector<128x16xf32>
    %cst_66 = arith.constant 0.000000e+00 : f32
    %112 = vector.broadcast %cst_66 : f32 to vector<128x16xf32>
    %113 = arith.maximumf %111, %112 : vector<128x16xf32>
    %114 = vector.extract_strided_slice %113 {offsets = [0, 0], sizes = [64, 16], strides = [1, 1]} : vector<128x16xf32> to vector<64x16xf32>
    %cst_67 = arith.constant dense<0.000000e+00> : vector<16x16xf32>
    %115 = tpu.matmul %0, %114, %cst_67 {dimension_numbers = #tpu.dot_dimension_numbers<[1], [0], [0], [1], [0, 0, 1, 1], [], []>} : vector<16x64xf32>, vector<64x16xf32>, vector<16x16xf32> -> vector<16x16xf32>
    %116 = arith.truncf %115 : vector<16x16xf32> to vector<16x16xbf16>
    %c7 = arith.constant 7 : index
    %c0_68 = arith.constant 0 : index
    %c0_69 = arith.constant 0 : index
    %117 = vector.load %arg1[%c7, %c0_68, %c0_69] : memref<10x32x32xbf16, #tpu.memory_space<vmem>>, vector<1x16x16xbf16>
    %118 = vector.shape_cast %117 : vector<1x16x16xbf16> to vector<16x16xbf16>
    %cst_70 = arith.constant dense<0.000000e+00> : vector<16x16xf32>
    %119 = tpu.matmul %116, %118, %cst_70 {dimension_numbers = #tpu.dot_dimension_numbers<[1], [0], [0], [1], [0, 0, 1, 1], [], []>} : vector<16x16xbf16>, vector<16x16xbf16>, vector<16x16xf32> -> vector<16x16xf32>
    %c95 = arith.constant 95 : index
    %c0_71 = arith.constant 0 : index
    %120 = vector.load %arg2[%c95, %c0_71] : memref<100x64xf32, #tpu.memory_space<vmem>>, vector<1x16xf32>
    %121 = vector.broadcast %120 : vector<1x16xf32> to vector<16x16xf32>
    %122 = arith.addf %119, %121 : vector<16x16xf32>
    %cst_72 = arith.constant 0.000000e+00 : f32
    %123 = vector.broadcast %cst_72 : f32 to vector<16x16xf32>
    %124 = arith.maximumf %122, %123 : vector<16x16xf32>
    %125 = vector.extract_strided_slice %113 {offsets = [64, 0], sizes = [64, 16], strides = [1, 1]} : vector<128x16xf32> to vector<64x16xf32>
    %cst_73 = arith.constant dense<0.000000e+00> : vector<16x16xf32>
    %126 = tpu.matmul %0, %125, %cst_73 {dimension_numbers = #tpu.dot_dimension_numbers<[1], [0], [0], [1], [0, 0, 1, 1], [], []>} : vector<16x64xf32>, vector<64x16xf32>, vector<16x16xf32> -> vector<16x16xf32>
    %127 = arith.truncf %126 : vector<16x16xf32> to vector<16x16xbf16>
    %c7_74 = arith.constant 7 : index
    %c0_75 = arith.constant 0 : index
    %c0_76 = arith.constant 0 : index
    %128 = vector.load %arg1[%c7_74, %c0_75, %c0_76] : memref<10x32x32xbf16, #tpu.memory_space<vmem>>, vector<1x16x16xbf16>
    %129 = vector.shape_cast %128 : vector<1x16x16xbf16> to vector<16x16xbf16>
    %cst_77 = arith.constant dense<0.000000e+00> : vector<16x16xf32>
    %130 = tpu.matmul %127, %129, %cst_77 {dimension_numbers = #tpu.dot_dimension_numbers<[1], [0], [0], [1], [0, 0, 1, 1], [], []>} : vector<16x16xbf16>, vector<16x16xbf16>, vector<16x16xf32> -> vector<16x16xf32>
    %c95_78 = arith.constant 95 : index
    %c0_79 = arith.constant 0 : index
    %131 = vector.load %arg2[%c95_78, %c0_79] : memref<100x64xf32, #tpu.memory_space<vmem>>, vector<1x16xf32>
    %132 = vector.broadcast %131 : vector<1x16xf32> to vector<16x16xf32>
    %133 = arith.addf %130, %132 : vector<16x16xf32>
    %cst_80 = arith.constant 0.000000e+00 : f32
    %134 = vector.broadcast %cst_80 : f32 to vector<16x16xf32>
    %135 = arith.maximumf %133, %134 : vector<16x16xf32>
    %136 = tpu.concatenate %124, %135 in 0 : vector<16x16xf32>, vector<16x16xf32> -> vector<32x16xf32>
    %137 = arith.truncf %113 : vector<128x16xf32> to vector<128x16xbf16>
    %c8 = arith.constant 8 : index
    %c0_81 = arith.constant 0 : index
    %c0_82 = arith.constant 0 : index
    %138 = vector.load %arg1[%c8, %c0_81, %c0_82] : memref<10x32x32xbf16, #tpu.memory_space<vmem>>, vector<1x16x14xbf16>
    %139 = vector.shape_cast %138 : vector<1x16x14xbf16> to vector<16x14xbf16>
    %cst_83 = arith.constant dense<0.000000e+00> : vector<128x14xf32>
    %140 = tpu.matmul %137, %139, %cst_83 {dimension_numbers = #tpu.dot_dimension_numbers<[1], [0], [0], [1], [0, 0, 1, 1], [], []>} : vector<128x16xbf16>, vector<16x14xbf16>, vector<128x14xf32> -> vector<128x14xf32>
    %c96 = arith.constant 96 : index
    %c0_84 = arith.constant 0 : index
    %141 = vector.load %arg2[%c96, %c0_84] : memref<100x64xf32, #tpu.memory_space<vmem>>, vector<1x14xf32>
    %142 = vector.broadcast %141 : vector<1x14xf32> to vector<128x14xf32>
    %143 = arith.addf %140, %142 : vector<128x14xf32>
    %144 = tpu.iota {dimensions = array<i32: 1>} : vector<1x14xi32>
    %c8_i32 = arith.constant 8 : i32
    %145 = vector.broadcast %c8_i32 : i32 to vector<1x14xi32>
    %146 = arith.cmpi slt, %144, %145 : vector<1x14xi32>
    %cst_85 = arith.constant 0.000000e+00 : f32
    %147 = vector.broadcast %cst_85 : f32 to vector<128x14xf32>
    %148 = vector.shape_cast %146 : vector<1x14xi1> to vector<1x14xi1>
    %149 = vector.broadcast %148 : vector<1x14xi1> to vector<128x14xi1>
    %150 = arith.select %149, %143, %147 : vector<128x14xi1>, vector<128x14xf32>
    %cst_86 = arith.constant 1.000000e+00 : f32
    %151 = vector.broadcast %cst_86 : f32 to vector<128x14xf32>
    %152 = vector.shape_cast %146 : vector<1x14xi1> to vector<1x14xi1>
    %153 = vector.broadcast %152 : vector<1x14xi1> to vector<128x14xi1>
    %154 = arith.select %153, %151, %147 : vector<128x14xi1>, vector<128x14xf32>
    %c8_i32_87 = arith.constant 8 : i32
    %155 = vector.broadcast %c8_i32_87 : i32 to vector<1x14xi32>
    %156 = arith.cmpi sge, %144, %155 : vector<1x14xi32>
    %c11_i32 = arith.constant 11 : i32
    %157 = vector.broadcast %c11_i32 : i32 to vector<1x14xi32>
    %158 = arith.cmpi slt, %144, %157 : vector<1x14xi32>
    %159 = arith.andi %156, %158 : vector<1x14xi1>
    %cst_88 = arith.constant 0xFF800000 : f32
    %160 = vector.shape_cast %159 : vector<1x14xi1> to vector<1x14xi1>
    %161 = vector.broadcast %160 : vector<1x14xi1> to vector<128x14xi1>
    %162 = vector.broadcast %cst_88 : f32 to vector<128x14xf32>
    %163 = arith.select %161, %143, %162 : vector<128x14xi1>, vector<128x14xf32>
    %cst_89 = arith.constant dense<0xFF800000> : vector<128xf32>
    %164 = vector.multi_reduction <maximumf>, %163, %cst_89 [1] : vector<128x14xf32> to vector<128xf32>
    %165 = vector.shape_cast %164 : vector<128xf32> to vector<128x1xf32>
    %166 = vector.shape_cast %159 : vector<1x14xi1> to vector<1x14xi1>
    %167 = vector.broadcast %166 : vector<1x14xi1> to vector<128x14xi1>
    %168 = vector.shape_cast %165 : vector<128x1xf32> to vector<128x1xf32>
    %169 = vector.broadcast %168 : vector<128x1xf32> to vector<128x14xf32>
    %170 = arith.select %167, %169, %150 : vector<128x14xi1>, vector<128x14xf32>
    %c11_i32_90 = arith.constant 11 : i32
    %171 = vector.broadcast %c11_i32_90 : i32 to vector<1x14xi32>
    %172 = arith.cmpi sge, %144, %171 : vector<1x14xi32>
    %c14_i32 = arith.constant 14 : i32
    %173 = vector.broadcast %c14_i32 : i32 to vector<1x14xi32>
    %174 = arith.cmpi slt, %144, %173 : vector<1x14xi32>
    %175 = arith.andi %172, %174 : vector<1x14xi1>
    %cst_91 = arith.constant 0xFF800000 : f32
    %176 = vector.shape_cast %175 : vector<1x14xi1> to vector<1x14xi1>
    %177 = vector.broadcast %176 : vector<1x14xi1> to vector<128x14xi1>
    %178 = vector.broadcast %cst_91 : f32 to vector<128x14xf32>
    %179 = arith.select %177, %143, %178 : vector<128x14xi1>, vector<128x14xf32>
    %cst_92 = arith.constant dense<0xFF800000> : vector<128xf32>
    %180 = vector.multi_reduction <maximumf>, %179, %cst_92 [1] : vector<128x14xf32> to vector<128xf32>
    %181 = vector.shape_cast %180 : vector<128xf32> to vector<128x1xf32>
    %182 = vector.shape_cast %175 : vector<1x14xi1> to vector<1x14xi1>
    %183 = vector.broadcast %182 : vector<1x14xi1> to vector<128x14xi1>
    %184 = vector.shape_cast %181 : vector<128x1xf32> to vector<128x1xf32>
    %185 = vector.broadcast %184 : vector<128x1xf32> to vector<128x14xf32>
    %186 = arith.select %183, %185, %170 : vector<128x14xi1>, vector<128x14xf32>
    %187 = arith.subf %143, %186 : vector<128x14xf32>
    %188 = math.exp %187 : vector<128x14xf32>
    %c8_i32_93 = arith.constant 8 : i32
    %189 = vector.broadcast %c8_i32_93 : i32 to vector<1x14xi32>
    %190 = arith.cmpi sge, %144, %189 : vector<1x14xi32>
    %c11_i32_94 = arith.constant 11 : i32
    %191 = vector.broadcast %c11_i32_94 : i32 to vector<1x14xi32>
    %192 = arith.cmpi slt, %144, %191 : vector<1x14xi32>
    %193 = arith.andi %190, %192 : vector<1x14xi1>
    %194 = vector.shape_cast %193 : vector<1x14xi1> to vector<1x14xi1>
    %195 = vector.broadcast %194 : vector<1x14xi1> to vector<128x14xi1>
    %196 = arith.select %195, %188, %147 : vector<128x14xi1>, vector<128x14xf32>
    %cst_95 = arith.constant dense<0.000000e+00> : vector<128xf32>
    %197 = vector.multi_reduction <add>, %196, %cst_95 [1] : vector<128x14xf32> to vector<128xf32>
    %198 = vector.shape_cast %197 : vector<128xf32> to vector<128x1xf32>
    %199 = vector.shape_cast %193 : vector<1x14xi1> to vector<1x14xi1>
    %200 = vector.broadcast %199 : vector<1x14xi1> to vector<128x14xi1>
    %201 = vector.shape_cast %198 : vector<128x1xf32> to vector<128x1xf32>
    %202 = vector.broadcast %201 : vector<128x1xf32> to vector<128x14xf32>
    %203 = arith.select %200, %202, %154 : vector<128x14xi1>, vector<128x14xf32>
    %c11_i32_96 = arith.constant 11 : i32
    %204 = vector.broadcast %c11_i32_96 : i32 to vector<1x14xi32>
    %205 = arith.cmpi sge, %144, %204 : vector<1x14xi32>
    %c14_i32_97 = arith.constant 14 : i32
    %206 = vector.broadcast %c14_i32_97 : i32 to vector<1x14xi32>
    %207 = arith.cmpi slt, %144, %206 : vector<1x14xi32>
    %208 = arith.andi %205, %207 : vector<1x14xi1>
    %209 = vector.shape_cast %208 : vector<1x14xi1> to vector<1x14xi1>
    %210 = vector.broadcast %209 : vector<1x14xi1> to vector<128x14xi1>
    %211 = arith.select %210, %188, %147 : vector<128x14xi1>, vector<128x14xf32>
    %cst_98 = arith.constant dense<0.000000e+00> : vector<128xf32>
    %212 = vector.multi_reduction <add>, %211, %cst_98 [1] : vector<128x14xf32> to vector<128xf32>
    %213 = vector.shape_cast %212 : vector<128xf32> to vector<128x1xf32>
    %214 = vector.shape_cast %208 : vector<1x14xi1> to vector<1x14xi1>
    %215 = vector.broadcast %214 : vector<1x14xi1> to vector<128x14xi1>
    %216 = vector.shape_cast %213 : vector<128x1xf32> to vector<128x1xf32>
    %217 = vector.broadcast %216 : vector<128x1xf32> to vector<128x14xf32>
    %218 = arith.select %215, %217, %203 : vector<128x14xi1>, vector<128x14xf32>
    %219 = arith.divf %188, %218 : vector<128x14xf32>
    %220 = vector.shape_cast %146 : vector<1x14xi1> to vector<1x14xi1>
    %221 = vector.broadcast %220 : vector<1x14xi1> to vector<128x14xi1>
    %222 = arith.select %221, %143, %219 : vector<128x14xi1>, vector<128x14xf32>
    %c0_99 = arith.constant 0 : index
    %c0_100 = arith.constant 0 : index
    %223 = vector.load %arg3[%c0_99, %c0_100] : memref<128x14xf32, #tpu.memory_space<vmem>>, vector<128x14xf32>
    tpu.vector_store %arg3[%c0_99, %c0_100], %222 {strides = array<i32>} : memref<128x14xf32, #tpu.memory_space<vmem>>, vector<128x14xf32>,
    %224 = arith.truncf %136 : vector<32x16xf32> to vector<32x16xbf16>
    %c9 = arith.constant 9 : index
    %c0_101 = arith.constant 0 : index
    %c0_102 = arith.constant 0 : index
    %225 = vector.load %arg1[%c9, %c0_101, %c0_102] : memref<10x32x32xbf16, #tpu.memory_space<vmem>>, vector<1x16x14xbf16>
    %226 = vector.shape_cast %225 : vector<1x16x14xbf16> to vector<16x14xbf16>
    %cst_103 = arith.constant dense<0.000000e+00> : vector<32x14xf32>
    %227 = tpu.matmul %224, %226, %cst_103 {dimension_numbers = #tpu.dot_dimension_numbers<[1], [0], [0], [1], [0, 0, 1, 1], [], []>} : vector<32x16xbf16>, vector<16x14xbf16>, vector<32x14xf32> -> vector<32x14xf32>
    %c97 = arith.constant 97 : index
    %c0_104 = arith.constant 0 : index
    %228 = vector.load %arg2[%c97, %c0_104] : memref<100x64xf32, #tpu.memory_space<vmem>>, vector<1x14xf32>
    %229 = vector.broadcast %228 : vector<1x14xf32> to vector<32x14xf32>
    %230 = arith.addf %227, %229 : vector<32x14xf32>
    %231 = tpu.iota {dimensions = array<i32: 1>} : vector<1x14xi32>
    %c8_i32_105 = arith.constant 8 : i32
    %232 = vector.broadcast %c8_i32_105 : i32 to vector<1x14xi32>
    %233 = arith.cmpi slt, %231, %232 : vector<1x14xi32>
    %cst_106 = arith.constant 0.000000e+00 : f32
    %234 = vector.broadcast %cst_106 : f32 to vector<32x14xf32>
    %235 = vector.shape_cast %233 : vector<1x14xi1> to vector<1x14xi1>
    %236 = vector.broadcast %235 : vector<1x14xi1> to vector<32x14xi1>
    %237 = arith.select %236, %230, %234 : vector<32x14xi1>, vector<32x14xf32>
    %cst_107 = arith.constant 1.000000e+00 : f32
    %238 = vector.broadcast %cst_107 : f32 to vector<32x14xf32>
    %239 = vector.shape_cast %233 : vector<1x14xi1> to vector<1x14xi1>
    %240 = vector.broadcast %239 : vector<1x14xi1> to vector<32x14xi1>
    %241 = arith.select %240, %238, %234 : vector<32x14xi1>, vector<32x14xf32>
    %c8_i32_108 = arith.constant 8 : i32
    %242 = vector.broadcast %c8_i32_108 : i32 to vector<1x14xi32>
    %243 = arith.cmpi sge, %231, %242 : vector<1x14xi32>
    %c11_i32_109 = arith.constant 11 : i32
    %244 = vector.broadcast %c11_i32_109 : i32 to vector<1x14xi32>
    %245 = arith.cmpi slt, %231, %244 : vector<1x14xi32>
    %246 = arith.andi %243, %245 : vector<1x14xi1>
    %cst_110 = arith.constant 0xFF800000 : f32
    %247 = vector.shape_cast %246 : vector<1x14xi1> to vector<1x14xi1>
    %248 = vector.broadcast %247 : vector<1x14xi1> to vector<32x14xi1>
    %249 = vector.broadcast %cst_110 : f32 to vector<32x14xf32>
    %250 = arith.select %248, %230, %249 : vector<32x14xi1>, vector<32x14xf32>
    %cst_111 = arith.constant dense<0xFF800000> : vector<32xf32>
    %251 = vector.multi_reduction <maximumf>, %250, %cst_111 [1] : vector<32x14xf32> to vector<32xf32>
    %252 = vector.shape_cast %251 : vector<32xf32> to vector<32x1xf32>
    %253 = vector.shape_cast %246 : vector<1x14xi1> to vector<1x14xi1>
    %254 = vector.broadcast %253 : vector<1x14xi1> to vector<32x14xi1>
    %255 = vector.shape_cast %252 : vector<32x1xf32> to vector<32x1xf32>
    %256 = vector.broadcast %255 : vector<32x1xf32> to vector<32x14xf32>
    %257 = arith.select %254, %256, %237 : vector<32x14xi1>, vector<32x14xf32>
    %c11_i32_112 = arith.constant 11 : i32
    %258 = vector.broadcast %c11_i32_112 : i32 to vector<1x14xi32>
    %259 = arith.cmpi sge, %231, %258 : vector<1x14xi32>
    %c14_i32_113 = arith.constant 14 : i32
    %260 = vector.broadcast %c14_i32_113 : i32 to vector<1x14xi32>
    %261 = arith.cmpi slt, %231, %260 : vector<1x14xi32>
    %262 = arith.andi %259, %261 : vector<1x14xi1>
    %cst_114 = arith.constant 0xFF800000 : f32
    %263 = vector.shape_cast %262 : vector<1x14xi1> to vector<1x14xi1>
    %264 = vector.broadcast %263 : vector<1x14xi1> to vector<32x14xi1>
    %265 = vector.broadcast %cst_114 : f32 to vector<32x14xf32>
    %266 = arith.select %264, %230, %265 : vector<32x14xi1>, vector<32x14xf32>
    %cst_115 = arith.constant dense<0xFF800000> : vector<32xf32>
    %267 = vector.multi_reduction <maximumf>, %266, %cst_115 [1] : vector<32x14xf32> to vector<32xf32>
    %268 = vector.shape_cast %267 : vector<32xf32> to vector<32x1xf32>
    %269 = vector.shape_cast %262 : vector<1x14xi1> to vector<1x14xi1>
    %270 = vector.broadcast %269 : vector<1x14xi1> to vector<32x14xi1>
    %271 = vector.shape_cast %268 : vector<32x1xf32> to vector<32x1xf32>
    %272 = vector.broadcast %271 : vector<32x1xf32> to vector<32x14xf32>
    %273 = arith.select %270, %272, %257 : vector<32x14xi1>, vector<32x14xf32>
    %274 = arith.subf %230, %273 : vector<32x14xf32>
    %275 = math.exp %274 : vector<32x14xf32>
    %c8_i32_116 = arith.constant 8 : i32
    %276 = vector.broadcast %c8_i32_116 : i32 to vector<1x14xi32>
    %277 = arith.cmpi sge, %231, %276 : vector<1x14xi32>
    %c11_i32_117 = arith.constant 11 : i32
    %278 = vector.broadcast %c11_i32_117 : i32 to vector<1x14xi32>
    %279 = arith.cmpi slt, %231, %278 : vector<1x14xi32>
    %280 = arith.andi %277, %279 : vector<1x14xi1>
    %281 = vector.shape_cast %280 : vector<1x14xi1> to vector<1x14xi1>
    %282 = vector.broadcast %281 : vector<1x14xi1> to vector<32x14xi1>
    %283 = arith.select %282, %275, %234 : vector<32x14xi1>, vector<32x14xf32>
    %cst_118 = arith.constant dense<0.000000e+00> : vector<32xf32>
    %284 = vector.multi_reduction <add>, %283, %cst_118 [1] : vector<32x14xf32> to vector<32xf32>
    %285 = vector.shape_cast %284 : vector<32xf32> to vector<32x1xf32>
    %286 = vector.shape_cast %280 : vector<1x14xi1> to vector<1x14xi1>
    %287 = vector.broadcast %286 : vector<1x14xi1> to vector<32x14xi1>
    %288 = vector.shape_cast %285 : vector<32x1xf32> to vector<32x1xf32>
    %289 = vector.broadcast %288 : vector<32x1xf32> to vector<32x14xf32>
    %290 = arith.select %287, %289, %241 : vector<32x14xi1>, vector<32x14xf32>
    %c11_i32_119 = arith.constant 11 : i32
    %291 = vector.broadcast %c11_i32_119 : i32 to vector<1x14xi32>
    %292 = arith.cmpi sge, %231, %291 : vector<1x14xi32>
    %c14_i32_120 = arith.constant 14 : i32
    %293 = vector.broadcast %c14_i32_120 : i32 to vector<1x14xi32>
    %294 = arith.cmpi slt, %231, %293 : vector<1x14xi32>
    %295 = arith.andi %292, %294 : vector<1x14xi1>
    %296 = vector.shape_cast %295 : vector<1x14xi1> to vector<1x14xi1>
    %297 = vector.broadcast %296 : vector<1x14xi1> to vector<32x14xi1>
    %298 = arith.select %297, %275, %234 : vector<32x14xi1>, vector<32x14xf32>
    %cst_121 = arith.constant dense<0.000000e+00> : vector<32xf32>
    %299 = vector.multi_reduction <add>, %298, %cst_121 [1] : vector<32x14xf32> to vector<32xf32>
    %300 = vector.shape_cast %299 : vector<32xf32> to vector<32x1xf32>
    %301 = vector.shape_cast %295 : vector<1x14xi1> to vector<1x14xi1>
    %302 = vector.broadcast %301 : vector<1x14xi1> to vector<32x14xi1>
    %303 = vector.shape_cast %300 : vector<32x1xf32> to vector<32x1xf32>
    %304 = vector.broadcast %303 : vector<32x1xf32> to vector<32x14xf32>
    %305 = arith.select %302, %304, %290 : vector<32x14xi1>, vector<32x14xf32>
    %306 = arith.divf %275, %305 : vector<32x14xf32>
    %307 = vector.shape_cast %233 : vector<1x14xi1> to vector<1x14xi1>
    %308 = vector.broadcast %307 : vector<1x14xi1> to vector<32x14xi1>
    %309 = arith.select %308, %230, %306 : vector<32x14xi1>, vector<32x14xf32>
    %c0_122 = arith.constant 0 : index
    %c0_123 = arith.constant 0 : index
    %310 = vector.load %arg4[%c0_122, %c0_123] : memref<32x14xf32, #tpu.memory_space<vmem>>, vector<32x14xf32>
    tpu.vector_store %arg4[%c0_122, %c0_123], %309 {strides = array<i32>} : memref<32x14xf32, #tpu.memory_space<vmem>>, vector<32x14xf32>,
    return
  }
}

</mosaic_0001>

<bundles_post_ra>
// kernel: forward.1
= control target key start
LH: loop header
LB: loop body
LE: loop exit
PB: predicated region body
PF: predicated region fallthrough
CT: control target
= control target key end

     0   :  { %vm85_vm0 = vcmask 1041408   ;;  %vm60_vm1 = vcmask 31744   ;;  %vm242_vm2 = vcmask 1043456   ;;  %vm217_vm3 = vcmask 64512   ;;  %s5131_s1 = inlined_call_operand.vmem [shape: bf16[10,32,32], index: 1, kind: input, shape index: {}]   ;;  %s5132_s0 = inlined_call_operand.vmem [shape: f32[128,4], index: 0, kind: input, shape index: {}]   ;;  %s5133_s2 = inlined_call_operand.vmem [shape: f32[100,64], index: 2, kind: input, shape index: {}]   ;;  %s5134_s3 = inlined_call_operand.vmem [shape: f32[128,14], index: 3, kind: output, shape index: {0}]   ;;  %s5135_s4 = inlined_call_operand.vmem [shape: f32[32,14], index: 4, kind: output, shape index: {1}]  }
   0x1   :  { %v54_v0 = vld [vmem:[%s5131_s1] sm:$0x3]  ;;  %v31_v2 = vld [vmem:[%s5132_s0 + $0x8] sm:$0xff]  ;;  %v32_v5 = vld [vmem:[%s5132_s0 + $0x10] sm:$0xff]  ;;  %vm359_vm4 = vcmask 523264   ;;  %v5136_v59 = vmov 0.0  }
   0x2   :  { %v30_v1 = vld [vmem:[%s5132_s0] sm:$0xff]  ;;  %3353 = vmatprep.subr.msk.bf16.mxu0 %vm85_vm0, %v54_v0  ;;  %v87_v3 = vsel %vm85_vm0, %v54_v0, 0  ;;  %v33_v6 = vld [vmem:[%s5132_s0 + $0x18] sm:$0xff]  ;;  %v35_v9 = vld [vmem:[%s5132_s0 + $0x28] sm:$0xff]  ;;  %vm3515_vm5 = vmmov 0   ;;  %vm464_vm6 = vcmask 261120  }
   0x3   :  { %v46_v4 = vpack.c.bf16 %v31_v2, %v30_v1  ;;  %v34_v7 = vld [vmem:[%s5132_s0 + $0x20] sm:$0xff]  ;;  %3052 = vmatpush3.bf16.msra.mxu0 %v87_v3  ;;  %v47_v8 = vpack.c.bf16 %v33_v6, %v32_v5  ;;  %v36_v11 = vld [vmem:[%s5132_s0 + $0x30] sm:$0xff]  ;;  %v37_v12 = vld [vmem:[%s5132_s0 + $0x38] sm:$0xff]  ;;  %vm511_vm7 = vcmask 130048   ;;  %vm2153_vm14 = vcmask 113664  }
   0x4   :  { %v48_v10 = vpack.c.bf16 %v35_v9, %v34_v7  ;;  %v49_v13 = vpack.c.bf16 %v37_v12, %v36_v11  ;;  %v2775_v14 = vld [vmem:[%s5131_s1 + $0x10] sm:$0xf]  ;;  %v3580_v18 = vld [vmem:[%s5133_s2 + $0x58] ss:$0 sm:$0xff]  ;;  %v38_v45 = vld [vmem:[%s5132_s0 + $0x40] sm:$0xff] }
   0x5   :  { %3053 = vmatprep.mubr.msk.bf16.mxu0 %vm60_vm1, %v46_v4  ;;  %3354 = vmatprep.subr.msk.bf16.mxu1 %vm242_vm2, %v2775_v14  ;;  %v244_v15 = vsel %vm242_vm2, %v2775_v14, 0  ;;  %v39_v46 = vld [vmem:[%s5132_s0 + $0x48] sm:$0xff]  ;;  %v40_v48 = vld [vmem:[%s5132_s0 + $0x50] sm:$0xff]  ;;  %v41_v49 = vld [vmem:[%s5132_s0 + $0x58] sm:$0xff] }
   0x6   :  { %3054 = vmatmul.mubr.msk.bf16.vlgmr.msra.gmra.mxu0 %vm60_vm1, %v47_v8  ;;  %3070 = vmatpush3.bf16.msra.mxu1 %v244_v15  ;;  %v50_v47 = vpack.c.bf16 %v39_v46, %v38_v45  ;;  %v51_v50 = vpack.c.bf16 %v41_v49, %v40_v48  ;;  %v42_v51 = vld [vmem:[%s5132_s0 + $0x60] sm:$0xff]  ;;  %v43_v52 = vld [vmem:[%s5132_s0 + $0x68] sm:$0xff]  ;;  %v44_v54 = vld [vmem:[%s5132_s0 + $0x70] sm:$0xff] }
   0x7   :  { %3057 = vmatprep.mubr.msk.bf16.mxu0 %vm60_vm1, %v48_v10  ;;  %v52_v53 = vpack.c.bf16 %v43_v52, %v42_v51  ;;  %v45_v55 = vld [vmem:[%s5132_s0 + $0x78] sm:$0xff]  ;;  %v3625_v57 = vld [vmem:[%s5133_s2] sm:$0xff]  ;;  %v3357_v58 = vld [vmem:[%s5131_s1 + $0x28] sm:$0xff]   ;;  %3106 = vmatprep.subr.bf16.mxu1 %v5136_v59 }
   0x8   :  { %v53_v56 = vpack.c.bf16 %v45_v55, %v44_v54  ;;  %v3637_v2 = vld [vmem:[%s5133_s2 + $0x59] ss:$0 sm:$0xff]  ;;  %v3358_v51 = vld [vmem:[%s5131_s1 + $0x20] sm:$0xff]   ;;  %v3712_v54 = vld [vmem:[%s5133_s2 + $0x10] sm:$0xff] }
   0xe   :  { %3058 = vmatmul.mubr.msk.bf16.gmra.mxu0 %vm60_vm1, %v49_v13 }
   0xf   :  { %3061 = vmatprep.mubr.msk.bf16.mxu0 %vm60_vm1, %v50_v47 }
  0x16   :  { %3062 = vmatmul.mubr.msk.bf16.gmra.mxu0 %vm60_vm1, %v51_v50 }
  0x17   :  { %3065 = vmatprep.mubr.msk.bf16.mxu0 %vm60_vm1, %v52_v53 }
  0x1e   :  { %3066 = vmatmul.mubr.msk.bf16.gmra.mxu0 %vm60_vm1, %v53_v56 }
  0x1f   :  { %3103 = vmatprep.mubr.msk.f32.mxu0 %vm359_vm4, %v3625_v57 }
  0xc6   :  { %v3055_v16 = vpop.f32.mrf.mxu0 }
  0xc7   :  { %v132_v22 = vadd.f32 %v3055_v16, %v3580_v18 }
  0xc8   :  { %v123_v17 = vpop.f32.mrf.mxu0 }
  0xc9   :  { %v124_v20 = vadd.f32 %v3580_v18, %v123_v17  ;;  %v188_v29 = vmax.f32 %v132_v22, 0.0  ;;  %v3680_v22 = vld [vmem:[%s5133_s2 + $0x8] sm:$0xff] }
  0xca   :  { %v3056_v19 = vpop.f32.mrf.mxu0 }
  0xcb   :  { %v135_v21 = vadd.f32 %v3056_v19, %v3580_v18  ;;  %v186_v27 = vmax.f32 %v124_v20, 0.0 }
  0xcc   :  { %v126_v23 = vpop.f32.mrf.mxu0 }
  0xcd   :  { %v127_v24 = vadd.f32 %v3580_v18, %v126_v23  ;;  %v189_v25 = vmax.f32 %v135_v21, 0.0 }
  0xce   :  { %v3059_v26 = vpop.f32.mrf.mxu0 }
  0xcf   :  { %v187_v28 = vmax.f32 %v127_v24, 0.0  ;;  %v203_v32 = vpack.c.bf16 %v189_v25, %v188_v29  ;;  %v148_v36 = vadd.f32 %v3059_v26, %v3580_v18 }
  0xd0   :  { %v139_v30 = vpop.f32.mrf.mxu0 }
  0xd1   :  { %v202_v31 = vpack.c.bf16 %v187_v28, %v186_v27  ;;  %v140_v34 = vadd.f32 %v3580_v18, %v139_v30  ;;  %v192_v42 = vmax.f32 %v148_v36, 0.0 }
  0xd2   :  { %v3060_v33 = vpop.f32.mrf.mxu0 }
  0xd3   :  { %v151_v35 = vadd.f32 %v3060_v33, %v3580_v18  ;;  %3071 = vmatprep.mubr.msk.bf16.mxu1 %vm217_vm3, %v202_v31  ;;  %v190_v40 = vmax.f32 %v140_v34, 0.0 }
  0xd4   :  { %v142_v37 = vpop.f32.mrf.mxu0  ;;  %3072 = vmatmul.mubr.msk.bf16.vlgmr.msra.gmra.mxu1 %vm217_vm3, %v203_v32 }
  0xd5   :  { %v143_v38 = vadd.f32 %v3580_v18, %v142_v37  ;;  %v193_v39 = vmax.f32 %v151_v35, 0.0  ;;  %3107 = vmatpush3.bf16.msra.mxu1 %v3357_v58 }
  0xd6   :  { %3108 = vmatprep.subr.bf16.mxu1 %v5136_v59  ;;  %v3063_v23 = vpop.f32.mrf.mxu0 }
  0xd7   :  { %v191_v41 = vmax.f32 %v143_v38, 0.0  ;;  %v205_v44 = vpack.c.bf16 %v193_v39, %v192_v42  ;;  %v164_v24 = vadd.f32 %v3063_v23, %v3580_v18  ;;  %v3728_v23 = vld [vmem:[%s5133_s2 + $0x18] sm:$0xff] }
  0xd8   :  { %v155_v25 = vpop.f32.mrf.mxu0 }
  0xd9   :  { %v204_v43 = vpack.c.bf16 %v191_v41, %v190_v40  ;;  %v156_v26 = vadd.f32 %v3580_v18, %v155_v25  ;;  %v196_v29 = vmax.f32 %v164_v24, 0.0  ;;  %3109 = vmatpush3.bf16.msra.mxu1 %v3358_v51 }
  0xda   :  { %v3064_v27 = vpop.f32.mrf.mxu0 }
  0xdb   :  { %3075 = vmatprep.mubr.msk.bf16.mxu1 %vm217_vm3, %v204_v43  ;;  %v167_v28 = vadd.f32 %v3064_v27, %v3580_v18  ;;  %v194_v31 = vmax.f32 %v156_v26, 0.0  ;;  %v3736_v26 = vld [vmem:[%s5133_s2 + $0x20] sm:$0xff] }
  0xdc   :  { %3076 = vmatmul.mubr.msk.bf16.gmra.mxu1 %vm217_vm3, %v205_v44  ;;  %v158_v30 = vpop.f32.mrf.mxu0 }
  0xdd   :  { %v197_v32 = vmax.f32 %v167_v28, 0.0  ;;  %v159_v33 = vadd.f32 %v3580_v18, %v158_v30 }
  0xde   :  { %v3067_v34 = vpop.f32.mrf.mxu0 }
  0xdf   :  { %v195_v35 = vmax.f32 %v159_v33, 0.0  ;;  %v207_v36 = vpack.c.bf16 %v197_v32, %v196_v29  ;;  %v180_v37 = vadd.f32 %v3067_v34, %v3580_v18  ;;  %v3750_v29 = vld [vmem:[%s5133_s2 + $0x28] sm:$0xff]  ;;  %v3759_v32 = vld [vmem:[%s5133_s2 + $0x30] sm:$0xff] }
  0xe0   :  { %v171_v38 = vpop.f32.mrf.mxu0 }
  0xe1   :  { %v206_v39 = vpack.c.bf16 %v195_v35, %v194_v31  ;;  %v172_v40 = vadd.f32 %v3580_v18, %v171_v38  ;;  %v200_v43 = vmax.f32 %v180_v37, 0.0  ;;  %v3774_v35 = vld [vmem:[%s5133_s2 + $0x38] sm:$0xff]  ;;  %v3783_v38 = vld [vmem:[%s5133_s2 + $0x40] sm:$0xff] }
  0xe2   :  { %v3068_v41 = vpop.f32.mrf.mxu0 }
  0xe3   :  { %v183_v42 = vadd.f32 %v3068_v41, %v3580_v18  ;;  %3079 = vmatprep.mubr.msk.bf16.mxu1 %vm217_vm3, %v206_v39  ;;  %v198_v45 = vmax.f32 %v172_v40, 0.0  ;;  %v3798_v41 = vld [vmem:[%s5133_s2 + $0x48] sm:$0xff] }
  0xe4   :  { %v174_v44 = vpop.f32.mrf.mxu0  ;;  %3080 = vmatmul.mubr.msk.bf16.gmra.mxu1 %vm217_vm3, %v207_v36 }
  0xe5   :  { %v201_v46 = vmax.f32 %v183_v42, 0.0  ;;  %v175_v47 = vadd.f32 %v3580_v18, %v174_v44 }
  0xe7   :  { %v199_v48 = vmax.f32 %v175_v47, 0.0  ;;  %v209_v49 = vpack.c.bf16 %v201_v46, %v200_v43 }
  0xe9   :  { %v208_v50 = vpack.c.bf16 %v199_v48, %v198_v45 }
  0xeb   :  { %3083 = vmatprep.mubr.msk.bf16.mxu1 %vm217_vm3, %v208_v50 }
  0xec   :  { %3084 = vmatmul.mubr.msk.bf16.gmra.mxu1 %vm217_vm3, %v209_v49 }
  0xed   :  { %3110 = vmatprep.mubr.msk.bf16.mxu1 %vm3515_vm5, %v5136_v59 }
 0x194   :  { %v3073_v60 = vpop.f32.mrf.mxu1 }
 0x195   :  { %v289_v13 = vadd.f32 %v3073_v60, %v3637_v2 }
 0x196   :  { %v280_v61 = vpop.f32.mrf.mxu1 }
 0x197   :  { %v3664_v17 = vmax.f32 %v289_v13, 0.0  ;;  %v281_v19 = vadd.f32 %v3637_v2, %v280_v61 }
 0x198   :  { %v3074_v62 = vpop.f32.mrf.mxu1 }
 0x199   :  { %v292_v11 = vadd.f32 %v3074_v62, %v3637_v2  ;;  %v3673_v21 = vmax.f32 %v281_v19, 0.0 }
 0x19a   :  { %v283_v63 = vpop.f32.mrf.mxu1 }
 0x19b   :  { %v3659_v15 = vmax.f32 %v292_v11, 0.0  ;;  %v284_v16 = vadd.f32 %v3637_v2, %v283_v63 }
 0x19c   :  { %v3077_v0 = vpop.f32.mrf.mxu1 }
 0x19d   :  { %v305_v4 = vadd.f32 %v3077_v0, %v3637_v2  ;;  %v3669_v20 = vmax.f32 %v284_v16, 0.0 }
 0x19e   :  { %v296_v1 = vpop.f32.mrf.mxu1 }
 0x19f   :  { %v3644_v9 = vmax.f32 %v305_v4, 0.0  ;;  %v297_v10 = vadd.f32 %v3637_v2, %v296_v1 }
 0x1a0   :  { %v3078_v3 = vpop.f32.mrf.mxu1 }
 0x1a1   :  { %v308_v5 = vadd.f32 %v3078_v3, %v3637_v2  ;;  %v3655_v14 = vmax.f32 %v297_v10, 0.0  ;;  %v3719_v3 = vld [vmem:[%s5133_s2 + $0x5a] ss:$0 sm:$0xff] }
 0x1a2   :  { %v299_v6 = vpop.f32.mrf.mxu1 }
 0x1a3   :  { %v3641_v7 = vmax.f32 %v308_v5, 0.0  ;;  %v300_v8 = vadd.f32 %v3637_v2, %v299_v6 }
 0x1a4   :  { %v3081_v55 = vpop.f32.mrf.mxu1 }
 0x1a5   :  { %3087 = vmatprep.subr.mxu0 %v3641_v7  ;;  %v3650_v12 = vmax.f32 %v300_v8, 0.0  ;;  %v321_v33 = vadd.f32 %v3081_v55, %v3637_v2 }
 0x1a6   :  { %3088 = vmatpush3.msra.mxu0 %v3641_v7  ;;  %v312_v56 = vpop.f32.mrf.mxu1 }
 0x1a7   :  { %3089 = vmatprep.subr.mxu0 %v3644_v9  ;;  %v3786_v39 = vmax.f32 %v321_v33, 0.0  ;;  %v313_v40 = vadd.f32 %v3637_v2, %v312_v56 }
 0x1a8   :  { %3090 = vmatpush3.msra.mxu0 %v3644_v9 }
 0x1a9   :  { %3091 = vmatprep.subr.mxu0 %v3650_v12 }
 0x1aa   :  { %3092 = vmatpush3.msra.mxu0 %v3650_v12 }
 0x1ab   :  { %3093 = vmatprep.subr.mxu0 %v3655_v14 }
 0x1ac   :  { %3094 = vmatpush3.msra.mxu0 %v3655_v14 }
 0x1ad   :  { %3095 = vmatprep.subr.mxu0 %v3659_v15 }
 0x1ae   :  { %3096 = vmatpush3.msra.mxu0 %v3659_v15 }
 0x1af   :  { %3097 = vmatprep.subr.mxu0 %v3664_v17 }
 0x1b0   :  { %3098 = vmatpush3.msra.mxu0 %v3664_v17 }
 0x1b1   :  { %3099 = vmatprep.subr.mxu0 %v3669_v20 }
 0x1b2   :  { %3100 = vmatpush3.msra.mxu0 %v3669_v20 }
 0x1b3   :  { %3101 = vmatprep.subr.mxu0 %v3673_v21 }
 0x1b4   :  { %3102 = vmatpush3.msra.mxu0 %v3673_v21 }
 0x1b5   :  { %3104 = vmatmul.mubr.msk.f32.vlgmr.msra.gmra.mxu0 %vm359_vm4, %v3680_v22  ;;  %3149 = vmatprep.subr.bf16.mxu0 %v5136_v59 }
 0x1b6   :  { %3150 = vmatpush3.bf16.msra.mxu0 %v3357_v58  ;;  %3153 = vmatprep.mubr.msk.bf16.mxu0 %vm3515_vm5, %v5136_v59  ;;  %v3082_v58 = vpop.f32.mrf.mxu1 }
 0x1b7   :  { %3151 = vmatprep.subr.bf16.mxu0 %v5136_v59  ;;  %v324_v30 = vadd.f32 %v3082_v58, %v3637_v2 }
 0x1b8   :  { %v315_v60 = vpop.f32.mrf.mxu1 }
 0x1b9   :  { %v3776_v36 = vmax.f32 %v324_v30, 0.0  ;;  %v316_v37 = vadd.f32 %v3637_v2, %v315_v60 }
 0x1ba   :  { %3152 = vmatpush3.bf16.msra.mxu0 %v3358_v51  ;;  %v3085_v61 = vpop.f32.mrf.mxu1 }
 0x1bb   :  { %3173 = vmatprep.subr.mxu0 %v5136_v59  ;;  %v337_v16 = vadd.f32 %v3085_v61, %v3637_v2  ;;  %v3800_v42 = vmax.f32 %v316_v37, 0.0 }
 0x1bc   :  { %v328_v62 = vpop.f32.mrf.mxu1 }
 0x1bd   :  { %v3738_v27 = vmax.f32 %v337_v16, 0.0  ;;  %v329_v28 = vadd.f32 %v3637_v2, %v328_v62 }
 0x1be   :  { %v3086_v63 = vpop.f32.mrf.mxu1 }
 0x1bf   :  { %v340_v11 = vadd.f32 %v3086_v63, %v3637_v2  ;;  %v3763_v34 = vmax.f32 %v329_v28, 0.0  ;;  %v3359_v63 = vld [vmem:[%s5131_s1 + $0x38] sm:$0xff]  }
 0x1c0   :  { %v331_v0 = vpop.f32.mrf.mxu1  ;;  %v3914_v28 = vld [vmem:[%s5133_s2 + $0x5b] sm:$0x1] }
 0x1c1   :  { %v3730_v24 = vmax.f32 %v340_v11, 0.0  ;;  %v332_v25 = vadd.f32 %v3637_v2, %v331_v0  ;;  %v3804_v2 = vmax.f32 %v313_v40, 0.0  ;;  %v3360_v0 = vld [vmem:[%s5131_s1 + $0x30] sm:$0xff]  }
 0x1c3   :  { %v3753_v31 = vmax.f32 %v332_v25, 0.0 }
 0x275   :  { %v3105_v18 = vpop.f32.mrf.mxu0 }
 0x277   :  { %v432_v52 = vpop.f32.mrf.mxu0 }
 0x278   :  { %v441_v53 = vpack.c.bf16 %v3105_v18, %v432_v52 }
 0x27a   :  { %3111 = vmatmul.mubr.msk.bf16.vlgmr.msra.gmra.mxu1 %vm464_vm6, %v441_v53 }
 0x27b   :  { %3118 = vmatprep.mubr.msk.f32.mxu1 %vm511_vm7, %v3712_v54 }
 0x33a   :  { %v502_v1 = vpop.f32.mrf.mxu1 }
 0x33b   :  { %v503_v6 = vadd.f32 %v3719_v3, %v502_v1 }
 0x33c   :  { %v3112_v4 = vpop.f32.mrf.mxu1 }
 0x33d   :  { %v509_v19 = vmax.f32 %v503_v6, 0.0 }
 0x33e   :  { %v505_v5 = vpop.f32.mrf.mxu1 }
 0x33f   :  { %v506_v8 = vadd.f32 %v3719_v3, %v505_v5  ;;  %v2822_v5 = vld [vmem:[%s5131_s1 + $0x40] sm:$0xf] }
 0x340   :  { %v3113_v10 = vpop.f32.mrf.mxu1  ;;  %v3904_v6 = vsel %vm242_vm2, %v2822_v5, 0 }
 0x341   :  { %v510_v13 = vmax.f32 %v506_v8, 0.0 }
 0x343   :  { %3114 = vmatprep.subr.mxu1 %v510_v13 }
 0x344   :  { %3115 = vmatpush3.msra.mxu1 %v510_v13 }
 0x345   :  { %3116 = vmatprep.subr.mxu1 %v509_v19 }
 0x346   :  { %3117 = vmatpush3.msra.mxu1 %v509_v19 }
 0x347   :  { %3119 = vmatmul.mubr.msk.f32.vlgmr.msra.gmra.mxu1 %vm511_vm7, %v3728_v23  ;;  %3130 = vmatprep.subr.mxu1 %v3730_v24 }
 0x348   :  { %3131 = vmatpush3.msra.mxu1 %v3730_v24  ;;  %3121 = vmatprep.mubr.msk.f32.mxu1 %vm511_vm7, %v3736_v26 }
 0x349   :  { %3132 = vmatprep.subr.mxu1 %v3738_v27 }
 0x34a   :  { %3133 = vmatpush3.msra.mxu1 %v3738_v27 }
 0x34b   :  { %3122 = vmatmul.mubr.msk.f32.gmra.mxu1 %vm511_vm7, %v3750_v29  ;;  %3134 = vmatprep.subr.mxu1 %v3753_v31 }
 0x34c   :  { %3135 = vmatpush3.msra.mxu1 %v3753_v31  ;;  %3124 = vmatprep.mubr.msk.f32.mxu1 %vm511_vm7, %v3759_v32 }
 0x34d   :  { %3136 = vmatprep.subr.mxu1 %v3763_v34 }
 0x34e   :  { %3137 = vmatpush3.msra.mxu1 %v3763_v34 }
 0x34f   :  { %3125 = vmatmul.mubr.msk.f32.gmra.mxu1 %vm511_vm7, %v3774_v35  ;;  %3138 = vmatprep.subr.mxu1 %v3776_v36 }
 0x350   :  { %3139 = vmatpush3.msra.mxu1 %v3776_v36  ;;  %3127 = vmatprep.mubr.msk.f32.mxu1 %vm511_vm7, %v3783_v38 }
 0x351   :  { %3140 = vmatprep.subr.mxu1 %v3786_v39 }
 0x352   :  { %3141 = vmatpush3.msra.mxu1 %v3786_v39 }
 0x353   :  { %3128 = vmatmul.mubr.msk.f32.gmra.mxu1 %vm511_vm7, %v3798_v41  ;;  %3142 = vmatprep.subr.mxu1 %v3800_v42 }
 0x354   :  { %3143 = vmatpush3.msra.mxu1 %v3800_v42  ;;  %3146 = vmatprep.mubr.msk.f32.mxu1 %vm359_vm4, %v3625_v57 }
 0x355   :  { %3144 = vmatprep.subr.mxu1 %v3804_v2 }
 0x356   :  { %3145 = vmatpush3.msra.mxu1 %v3804_v2 }
 0x357   :  { %3147 = vmatmul.mubr.msk.f32.vlgmr.msra.gmra.mxu1 %vm359_vm4, %v3680_v22 }
 0x358   :  { %3161 = vmatprep.mubr.msk.f32.mxu1 %vm511_vm7, %v3712_v54 }
 0x407   :  { %v3120_v43 = vpop.f32.mrf.mxu1 }
 0x409   :  { %v602_v44 = vpop.f32.mrf.mxu1 }
 0x40b   :  { %v3123_v45 = vpop.f32.mrf.mxu1 }
 0x40d   :  { %v612_v46 = vpop.f32.mrf.mxu1 }
 0x40f   :  { %v3126_v47 = vpop.f32.mrf.mxu1 }
 0x410   :  { %v3830_v54 = vadd.f32 %v3126_v47, %v3650_v12  ;;  %v3845_v12 = vadd.f32 %v612_v46, %v3664_v17  ;;  %v3861_v17 = vld [vmem:[%s5133_s2 + $0x50] sm:$0x1] }
 0x411   :  { %v622_v48 = vpop.f32.mrf.mxu1 }
 0x413   :  { %v3129_v49 = vpop.f32.mrf.mxu1 }
 0x414   :  { %v3819_v53 = vadd.f32 %v3129_v49, %v3641_v7  ;;  %v3835_v7 = vadd.f32 %v622_v48, %v3655_v14  ;;  %v3850_v14 = vadd.f32 %v3120_v43, %v3669_v20 }
 0x415   :  { %v632_v50 = vpop.f32.mrf.mxu1 }
 0x416   :  { %v3823_v22 = vadd.f32 %v632_v50, %v3644_v9  ;;  %v3840_v9 = vadd.f32 %v3123_v45, %v3659_v15  ;;  %v3855_v15 = vadd.f32 %v602_v44, %v3673_v21  ;;  %v1239_v44 = vpack.c.bf16 %v3830_v54, %v3835_v7 }
 0x417   :  { %v3148_v51 = vpop.f32.mrf.mxu1 }
 0x418   :  { %v1237_v43 = vpack.c.bf16 %v3850_v14, %v3855_v15  ;;  %v1240_v45 = vpack.c.bf16 %v3819_v53, %v3823_v22 }
 0x419   :  { %v707_v18 = vpop.f32.mrf.mxu1 }
 0x41a   :  { %v716_v52 = vpack.c.bf16 %v3148_v51, %v707_v18 }
 0x41c   :  { %3154 = vmatmul.mubr.msk.bf16.vlgmr.msra.gmra.mxu0 %vm464_vm6, %v716_v52 }
 0x41d   :  { %3174 = vmatpush3.msra.mxu0 %v3819_v53  ;;  %3189 = vmatprep.mubr.msk.f32.mxu0 %vm3515_vm5, %v5136_v59 }
 0x41e   :  { %3175 = vmatprep.subr.mxu0 %v5136_v59 }
 0x41f   :  { %3176 = vmatpush3.msra.mxu0 %v3823_v22 }
 0x420   :  { %3177 = vmatprep.subr.mxu0 %v5136_v59 }
 0x421   :  { %3178 = vmatpush3.msra.mxu0 %v3830_v54 }
 0x422   :  { %3179 = vmatprep.subr.mxu0 %v5136_v59 }
 0x423   :  { %3180 = vmatpush3.msra.mxu0 %v3835_v7 }
 0x424   :  { %3181 = vmatprep.subr.mxu0 %v5136_v59 }
 0x425   :  { %3182 = vmatpush3.msra.mxu0 %v3840_v9 }
 0x426   :  { %3183 = vmatprep.subr.mxu0 %v5136_v59 }
 0x427   :  { %3184 = vmatpush3.msra.mxu0 %v3845_v12 }
 0x428   :  { %3185 = vmatprep.subr.mxu0 %v5136_v59 }
 0x429   :  { %3186 = vmatpush3.msra.mxu0 %v3850_v14 }
 0x42a   :  { %3187 = vmatprep.subr.mxu0 %v5136_v59 }
 0x42b   :  { %3188 = vmatpush3.msra.mxu0 %v3855_v15 }
 0x42c   :  { %3190 = vmatmul.mubr.msk.f32.vlgmr.msra.gmra.mxu0 %vm359_vm4, %v3861_v17  ;;  %3200 = vmatprep.subr.bf16.mxu0 %v5136_v59 }
 0x42d   :  { %3202 = vmatprep.mubr.msk.bf16.mxu0 %vm3515_vm5, %v5136_v59  ;;  %3201 = vmatpush3.bf16.msra.mxu0 %v3904_v6 }
 0x42e   :  { %3225 = vmatprep.subr.bf16.mxu0 %v5136_v59 }
 0x4dc   :  { %v754_v20 = vpop.f32.mrf.mxu0 }
 0x4dd   :  { %v755_v56 = vadd.f32 %v3719_v3, %v754_v20 }
 0x4de   :  { %v3155_v21 = vpop.f32.mrf.mxu0 }
 0x4df   :  { %v761_v62 = vmax.f32 %v755_v56, 0.0 }
 0x4e0   :  { %v757_v55 = vpop.f32.mrf.mxu0 }
 0x4e1   :  { %v758_v58 = vadd.f32 %v3719_v3, %v757_v55 }
 0x4e2   :  { %v3156_v60 = vpop.f32.mrf.mxu0 }
 0x4e3   :  { %v762_v61 = vmax.f32 %v758_v58, 0.0 }
 0x4e5   :  { %3157 = vmatprep.subr.mxu1 %v762_v61 }
 0x4e6   :  { %3158 = vmatpush3.msra.mxu1 %v762_v61 }
 0x4e7   :  { %3159 = vmatprep.subr.mxu1 %v761_v62 }
 0x4e8   :  { %3160 = vmatpush3.msra.mxu1 %v761_v62 }
 0x4e9   :  { %3162 = vmatmul.mubr.msk.f32.vlgmr.msra.gmra.mxu1 %vm511_vm7, %v3728_v23  ;;  %3192 = vmatprep.subr.bf16.mxu1 %v5136_v59 }
 0x4ea   :  { %3164 = vmatprep.mubr.msk.f32.mxu1 %vm511_vm7, %v3736_v26  ;;  %3193 = vmatpush3.bf16.msra.mxu1 %v3359_v63 }
 0x4eb   :  { %3194 = vmatprep.subr.bf16.mxu1 %v5136_v59 }
 0x4ec   :  { %v953_v1 = vpop.f32.mrf.mxu0 }
 0x4ed   :  { %3165 = vmatmul.mubr.msk.f32.gmra.mxu1 %vm511_vm7, %v3750_v29  ;;  %v957_v4 = vpack.c.bf16 %v953_v1, %v953_v1 }
 0x4ee   :  { %3167 = vmatprep.mubr.msk.f32.mxu1 %vm511_vm7, %v3759_v32  ;;  %3195 = vmatpush3.bf16.msra.mxu1 %v3360_v0  ;;  %v3191_v3 = vpop.f32.mrf.mxu0 }
 0x4ef   :  { %3206 = vmatprep.subr.mxu1 %v5136_v59 }
 0x4f1   :  { %3168 = vmatmul.mubr.msk.f32.gmra.mxu1 %vm511_vm7, %v3774_v35 }
 0x4f2   :  { %3170 = vmatprep.mubr.msk.f32.mxu1 %vm511_vm7, %v3783_v38 }
 0x4f5   :  { %3171 = vmatmul.mubr.msk.f32.gmra.mxu1 %vm511_vm7, %v3798_v41 }
 0x4f6   :  { %3196 = vmatprep.mubr.msk.bf16.mxu1 %vm3515_vm5, %v5136_v59 }
 0x4f9   :  { %3197 = vmatmul.mubr.msk.bf16.vlgmr.msra.gmra.mxu1 %vm464_vm6, %v957_v4  ;;  %v2842_v4 = vld [vmem:[%s5133_s2 + $0x62] ss:$0 sm:$0xff] }
 0x4fa   :  { %3222 = vmatprep.mubr.msk.f32.mxu1 %vm3515_vm5, %v5136_v59 }
 0x5a9   :  { %v3163_v8 = vpop.f32.mrf.mxu1 }
 0x5ab   :  { %v829_v10 = vpop.f32.mrf.mxu1 }
 0x5ad   :  { %v3166_v11 = vpop.f32.mrf.mxu1 }
 0x5ae   :  { %v3933_v38 = vadd.f32 %v3166_v11, %v3776_v36  ;;  %v3361_v36 = vld [vmem:[%s5131_s1 + $0x58] sm:$0xff]  }
 0x5af   :  { %v839_v13 = vpop.f32.mrf.mxu1 }
 0x5b0   :  { %v3938_v41 = vadd.f32 %v839_v13, %v3786_v39  ;;  %v3955_v39 = vadd.f32 %v829_v10, %v3804_v2  ;;  %v1238_v2 = vpack.c.bf16 %v3840_v9, %v3845_v12 }
 0x5b1   :  { %v3169_v16 = vpop.f32.mrf.mxu1 }
 0x5b2   :  { %v3922_v32 = vadd.f32 %v3169_v16, %v3753_v31  ;;  %v1242_v47 = vpack.c.bf16 %v3933_v38, %v3938_v41 }
 0x5b3   :  { %v849_v19 = vpop.f32.mrf.mxu1 }
 0x5b4   :  { %v3928_v35 = vadd.f32 %v849_v19, %v3763_v34  ;;  %v3944_v34 = vadd.f32 %v3163_v8, %v3800_v42  ;;  %v3362_v42 = vld [vmem:[%s5131_s1 + $0x50] sm:$0xff]  }
 0x5b5   :  { %v3172_v23 = vpop.f32.mrf.mxu1 }
 0x5b6   :  { %v3909_v25 = vadd.f32 %v3172_v23, %v3730_v24  ;;  %v1241_v46 = vpack.c.bf16 %v3944_v34, %v3955_v39  ;;  %v1243_v48 = vpack.c.bf16 %v3922_v32, %v3928_v35 }
 0x5b7   :  { %v859_v26 = vpop.f32.mrf.mxu1 }
 0x5b8   :  { %v3917_v29 = vadd.f32 %v859_v26, %v3738_v27  ;;  %3207 = vmatpush3.msra.mxu1 %v3909_v25 }
 0x5b9   :  { %3208 = vmatprep.subr.mxu1 %v5136_v59  ;;  %v1013_v30 = vpop.f32.mrf.mxu1 }
 0x5ba   :  { %3209 = vmatpush3.msra.mxu1 %v3917_v29  ;;  %v1014_v24 = vadd.f32 %v1013_v30, %v3914_v28  ;;  %v1244_v49 = vpack.c.bf16 %v3909_v25, %v3917_v29 }
 0x5bb   :  { %3210 = vmatprep.subr.mxu1 %v5136_v59  ;;  %v3198_v33 = vpop.f32.mrf.mxu1 }
 0x5bc   :  { %3211 = vmatpush3.msra.mxu1 %v3922_v32  ;;  %v1019_v27 = vmax.f32 %v1014_v24, 0.0 }
 0x5bd   :  { %3212 = vmatprep.subr.mxu1 %v5136_v59  ;;  %v1016_v37 = vpop.f32.mrf.mxu1 }
 0x5be   :  { %3213 = vmatpush3.msra.mxu1 %v3928_v35  ;;  %v1020_v31 = vpack.c.bf16 %v1019_v27, %v1019_v27 }
 0x5bf   :  { %3214 = vmatprep.subr.mxu1 %v5136_v59  ;;  %v3199_v40 = vpop.f32.mrf.mxu1 }
 0x5c0   :  { %3215 = vmatpush3.msra.mxu1 %v3933_v38  ;;  %3203 = vmatmul.mubr.msk.bf16.vlgmr.msra.gmra.mxu0 %vm217_vm3, %v1020_v31 }
 0x5c1   :  { %3216 = vmatprep.subr.mxu1 %v5136_v59  ;;  %3226 = vmatpush3.bf16.msra.mxu0 %v3359_v63 }
 0x5c2   :  { %3217 = vmatpush3.msra.mxu1 %v3938_v41  ;;  %3227 = vmatprep.subr.bf16.mxu0 %v5136_v59 }
 0x5c3   :  { %3218 = vmatprep.subr.mxu1 %v5136_v59  ;;  %3229 = vmatprep.mubr.msk.bf16.mxu0 %vm3515_vm5, %v5136_v59 }
 0x5c4   :  { %3219 = vmatpush3.msra.mxu1 %v3944_v34 }
 0x5c5   :  { %3220 = vmatprep.subr.mxu1 %v5136_v59  ;;  %3228 = vmatpush3.bf16.msra.mxu0 %v3360_v0  ;;  %v2831_v0 = vld [vmem:[%s5133_s2 + $0x5d] ss:$0 sm:$0xff] }
 0x5c6   :  { %3221 = vmatpush3.msra.mxu1 %v3955_v39  ;;  %3233 = vmatprep.subr.bf16.mxu0 %v5136_v59 }
 0x5c7   :  { %3223 = vmatmul.mubr.msk.f32.vlgmr.msra.gmra.mxu1 %vm359_vm4, %v3861_v17  ;;  %3239 = vmatprep.subr.bf16.mxu1 %v3361_v36 }
 0x5c8   :  { %3240 = vmatpush3.bf16.msra.mxu1 %v3361_v36  ;;  %3243 = vmatprep.mubr.msk.bf16.mxu1 %vm464_vm6, %v1237_v43 }
 0x5c9   :  { %3241 = vmatprep.subr.bf16.mxu1 %v3362_v42 }
 0x5cc   :  { %3242 = vmatpush3.bf16.msra.mxu1 %v3362_v42 }
 0x5cf   :  { %3244 = vmatmul.mubr.msk.bf16.vlgmr.msra.gmra.mxu1 %vm464_vm6, %v1238_v2 }
 0x5d0   :  { %3247 = vmatprep.mubr.msk.bf16.mxu1 %vm464_vm6, %v1239_v44 }
 0x5d7   :  { %3248 = vmatmul.mubr.msk.bf16.gmra.mxu1 %vm464_vm6, %v1240_v45  ;;  %v4021_v45 = vld [vmem:[%s5131_s1 + $0x68] sm:$0xff]  }
 0x5d8   :  { %3251 = vmatprep.mubr.msk.bf16.mxu1 %vm464_vm6, %v1241_v46  ;;  %v1070_v46 = vlaneseq }
 0x5df   :  { %3252 = vmatmul.mubr.msk.bf16.gmra.mxu1 %vm464_vm6, %v1242_v47  ;;  %v4025_v47 = vshrl.u32 %v1070_v46, 7 }
 0x5e0   :  { %3255 = vmatprep.mubr.msk.bf16.mxu1 %vm464_vm6, %v1243_v48  ;;  %v4030_v48 = vld [vmem:[%s5133_s2 + $0x5c] sm:$0x1] }
 0x5e7   :  { %3256 = vmatmul.mubr.msk.bf16.gmra.mxu1 %vm464_vm6, %v1244_v49 }
 0x5e8   :  { %3295 = vmatprep.mubr.msk.f32.mxu1 %vm359_vm4, %v3625_v57 }
 0x680   :  { %v1064_v50 = vpop.f32.mrf.mxu0 }
 0x681   :  { %v1065_v49 = vadd.f32 %v1064_v50, %v4030_v48 }
 0x682   :  { %v3204_v51 = vpop.f32.mrf.mxu0 }
 0x683   :  { %v1072_v51 = vsub.s32 0, %v4025_v47 }
 0x684   :  { %v1067_v18 = vpop.f32.mrf.mxu0 }
 0x686   :  { %v3205_v52 = vpop.f32.mrf.mxu0 }
 0x687   :  { %v1140_v17 = vpop.f32.mrf.mxu1  ;;  %v1073_v52 = vrot.slane %v1065_v49, %v1072_v51 }
 0x688   :  { %v1144_v20 = vpack.c.bf16 %v1140_v17, %v1140_v17 }
 0x689   :  { %v3224_v21 = vpop.f32.mrf.mxu1 }
 0x68a   :  { %3230 = vmatmul.mubr.msk.bf16.vlgmr.msra.gmra.mxu0 %vm464_vm6, %v1144_v20  ;;  %v4039_v20 = vld [vmem:[%s5133_s2 + $0x63] ss:$0 sm:$0xff] }
 0x68b   :  { %3234 = vmatpush3.bf16.msra.mxu0 %v3904_v6  ;;  %3235 = vmatprep.mubr.msk.bf16.mxu0 %vm3515_vm5, %v5136_v59 }
 0x68c   :  { %3259 = vmatprep.subr.bf16.mxu0 %v4021_v45 }
 0x68f   :  { %v3245_v55 = vpop.f32.mrf.mxu1 }
 0x690   :  { %v1334_v50 = vadd.f32 %v3245_v55, %v2831_v0 }
 0x691   :  { %v1325_v56 = vpop.f32.mrf.mxu1 }
 0x692   :  { %v1326_v17 = vadd.f32 %v2831_v0, %v1325_v56 }
 0x693   :  { %v3246_v58 = vpop.f32.mrf.mxu1 }
 0x695   :  { %v1328_v60 = vpop.f32.mrf.mxu1 }
 0x696   :  { %v1329_v18 = vadd.f32 %v2831_v0, %v1328_v60 }
 0x697   :  { %v3249_v61 = vpop.f32.mrf.mxu1 }
 0x698   :  { %v1393_v21 = vmul.f32 %v2842_v4, %v1329_v18 }
 0x699   :  { %v1341_v57 = vpop.f32.mrf.mxu1 }
 0x69b   :  { %v3250_v62 = vpop.f32.mrf.mxu1 }
 0x69d   :  { %v1344_v63 = vpop.f32.mrf.mxu1 }
 0x69f   :  { %v3253_v1 = vpop.f32.mrf.mxu1 }
 0x6a0   :  { %v1366_v3 = vadd.f32 %v3253_v1, %v2831_v0  ;;  %v1412_v1 = vmul.f32 %v4039_v20, %v1073_v52 }
 0x6a1   :  { %v1357_v5 = vpop.f32.mrf.mxu1 }
 0x6a2   :  { %v4002_v6 = vmul.f32 %v2842_v4, %v1366_v3  ;;  %v1358_v8 = vadd.f32 %v2831_v0, %v1357_v5  ;;  %v1392_v3 = vmul.f32 %v2842_v4, %v1326_v17  ;;  %v1337_v5 = vadd.f32 %v3246_v58, %v2831_v0 }
 0x6a3   :  { %v3254_v10 = vpop.f32.mrf.mxu1 }
 0x6a4   :  { %v1369_v11 = vadd.f32 %v3254_v10, %v2831_v0  ;;  %v4004_v13 = vmul.f32 %v2842_v4, %v1358_v8  ;;  %v1415_v8 = vadd.f32 %v1412_v1, %v1393_v21  ;;  %v1345_v10 = vadd.f32 %v2831_v0, %v1344_v63 }
 0x6a5   :  { %v1360_v16 = vpop.f32.mrf.mxu1  ;;  %v1395_v60 = vmul.f32 %v2842_v4, %v1337_v5 }
 0x6a6   :  { %v4006_v19 = vmul.f32 %v2842_v4, %v1369_v11  ;;  %v1361_v23 = vadd.f32 %v2831_v0, %v1360_v16  ;;  %v1414_v11 = vadd.f32 %v1412_v1, %v1392_v3  ;;  %v1342_v16 = vadd.f32 %v2831_v0, %v1341_v57 }
 0x6a7   :  { %v3257_v26 = vpop.f32.mrf.mxu1 }
 0x6a8   :  { %v4008_v30 = vmul.f32 %v2842_v4, %v1361_v23  ;;  %v1382_v24 = vadd.f32 %v3257_v26, %v2831_v0  ;;  %v2845_v23 = vmul.f32 -1.442695, %v1415_v8  ;;  %v1397_v26 = vmul.f32 %v2842_v4, %v1345_v10 }
 0x6a9   :  { %v1373_v33 = vpop.f32.mrf.mxu1  ;;  %v2844_v56 = vmul.f32 -1.442695, %v1414_v11 }
 0x6aa   :  { %v4010_v27 = vmul.f32 %v2842_v4, %v1382_v24  ;;  %v1374_v37 = vadd.f32 %v2831_v0, %v1373_v33  ;;  %v1394_v24 = vmul.f32 %v2842_v4, %v1334_v50  ;;  %v1396_v33 = vmul.f32 %v2842_v4, %v1342_v16 }
 0x6ab   :  { %v3258_v31 = vpop.f32.mrf.mxu1  ;;  %3368 = vpow2.f32 %v2845_v23 }
 0x6ac   :  { %v4012_v40 = vmul.f32 %v2842_v4, %v1374_v37  ;;  %v1385_v36 = vadd.f32 %v3258_v31, %v2831_v0  ;;  %v1417_v37 = vadd.f32 %v1412_v1, %v1395_v60  ;;  %v1353_v31 = vadd.f32 %v3250_v62, %v2831_v0 }
 0x6ad   :  { %v1376_v42 = vpop.f32.mrf.mxu1  ;;  %3370 = vpow2.f32 %v2844_v56  ;;  %v1418_v49 = vadd.f32 %v1412_v1, %v1396_v33 }
 0x6ae   :  { %v4014_v43 = vmul.f32 %v2842_v4, %v1385_v36  ;;  %v1377_v2 = vadd.f32 %v2831_v0, %v1376_v42  ;;  %v1419_v36 = vadd.f32 %v1412_v1, %v1397_v26  ;;  %v1416_v42 = vadd.f32 %v1412_v1, %v1394_v24 }
 0x6af   :  { %v2847_v58 = vmul.f32 -1.442695, %v1417_v37  ;;  %v1399_v18 = vmul.f32 %v2842_v4, %v1353_v31  ;;  %v2848_v57 = vmul.f32 -1.442695, %v1418_v49 }
 0x6b0   :  { %v4016_v44 = vmul.f32 %v2842_v4, %v1377_v2  ;;  %v1350_v2 = vadd.f32 %v3249_v61, %v2831_v0  ;;  %v2849_v63 = vmul.f32 -1.442695, %v1419_v36  ;;  %v2846_v55 = vmul.f32 -1.442695, %v1416_v42 }
 0x6b1   :  { %3372 = vpow2.f32 %v2847_v58  ;;  %v1421_v17 = vadd.f32 %v1412_v1, %v1399_v18 }
 0x6b2   :  { %v1398_v52 = vmul.f32 %v2842_v4, %v1350_v2  ;;  %3374 = vpow2.f32 %v2849_v63 }
 0x6b3   :  { %3376 = vpow2.f32 %v2846_v55  ;;  %v2851_v3 = vmul.f32 -1.442695, %v1421_v17 }
 0x6b4   :  { %v1420_v21 = vadd.f32 %v1412_v1, %v1398_v52  ;;  %3378 = vpow2.f32 %v2848_v57  ;;  %v3364_v52 = vld [vmem:[%s5131_s1 + $0x60] sm:$0xff]  }
 0x6b5   :  { %3380 = vpow2.f32 %v2851_v3 }
 0x6b6   :  { %v2850_v5 = vmul.f32 -1.442695, %v1420_v21 }
 0x6b8   :  { %v3369_v62 = vpop.eup %3368  ;;  %3382 = vpow2.f32 %v2850_v5 }
 0x6b9   :  { %v1479_v61 = vadd.f32 1.0, %v3369_v62 }
 0x6ba   :  { %v3371_v8 = vpop.eup %3370 }
 0x6bb   :  { %v1478_v0 = vadd.f32 1.0, %v3371_v8  ;;  %3384 = vrcp.f32 %v1479_v61 }
 0x6bd   :  { %3386 = vrcp.f32 %v1478_v0 }
 0x6be   :  { %v3373_v10 = vpop.eup %3372 }
 0x6bf   :  { %v3375_v50 = vpop.eup %3374  ;;  %v1481_v16 = vadd.f32 1.0, %v3373_v10 }
 0x6c0   :  { %v3377_v11 = vpop.eup %3376  ;;  %v1483_v60 = vadd.f32 1.0, %v3375_v50 }
 0x6c1   :  { %v3379_v4 = vpop.eup %3378  ;;  %v1480_v23 = vadd.f32 1.0, %v3377_v11  ;;  %3388 = vrcp.f32 %v1481_v16 }
 0x6c2   :  { %v1482_v26 = vadd.f32 1.0, %v3379_v4  ;;  %v3381_v1 = vpop.eup %3380  ;;  %3390 = vrcp.f32 %v1483_v60 }
 0x6c3   :  { %3392 = vrcp.f32 %v1480_v23  ;;  %v1485_v56 = vadd.f32 1.0, %v3381_v1 }
 0x6c4   :  { %3394 = vrcp.f32 %v1482_v26 }
 0x6c5   :  { %v3383_v24 = vpop.eup %3382  ;;  %3396 = vrcp.f32 %v1485_v56 }
 0x6c6   :  { %v1484_v37 = vadd.f32 1.0, %v3383_v24 }
 0x6c8   :  { %v3385_v33 = vpop.eup %3384  ;;  %3398 = vrcp.f32 %v1484_v37 }
 0x6c9   :  { %v1527_v2 = vmul.f32 %v3385_v33, %v3850_v14 }
 0x6ca   :  { %v3387_v36 = vpop.eup %3386 }
 0x6cb   :  { %v1526_v18 = vmul.f32 %v3387_v36, %v3855_v15 }
 0x6cd   :  { %v1542_v17 = vpack.c.bf16 %v1527_v2, %v1526_v18 }
 0x6ce   :  { %v3389_v57 = vpop.eup %3388 }
 0x6cf   :  { %v3391_v3 = vpop.eup %3390  ;;  %v1529_v15 = vmul.f32 %v3389_v57, %v3840_v9 }
 0x6d0   :  { %v1531_v62 = vmul.f32 %v3391_v3, %v3830_v54 }
 0x74a   :  { %v1182_v31 = vpop.f32.mrf.mxu0 }
 0x74b   :  { %v1183_v42 = vadd.f32 %v1182_v31, %v3914_v28  ;;  %v3393_v28 = vpop.eup %3392 }
 0x74c   :  { %v3231_v49 = vpop.f32.mrf.mxu0  ;;  %v3395_v14 = vpop.eup %3394  ;;  %v1528_v5 = vmul.f32 %v3393_v28, %v3845_v12 }
 0x74d   :  { %v1188_v58 = vmax.f32 %v1183_v42, 0.0  ;;  %v1530_v8 = vmul.f32 %v3395_v14, %v3835_v7  ;;  %v3397_v0 = vpop.eup %3396 }
 0x74e   :  { %v1185_v63 = vpop.f32.mrf.mxu0  ;;  %v1543_v61 = vpack.c.bf16 %v1529_v15, %v1528_v5  ;;  %v1533_v50 = vmul.f32 %v3397_v0, %v3819_v53 }
 0x74f   :  { %v1189_v55 = vpack.c.bf16 %v1188_v58, %v1188_v58  ;;  %v1544_v10 = vpack.c.bf16 %v1531_v62, %v1530_v8 }
 0x750   :  { %v3232_v21 = vpop.f32.mrf.mxu0 }
 0x751   :  { %3236 = vmatmul.mubr.msk.bf16.vlgmr.msra.gmra.mxu0 %vm217_vm3, %v1189_v55 }
 0x752   :  { %3260 = vmatpush3.bf16.msra.mxu0 %v4021_v45  ;;  %3263 = vmatprep.mubr.msk.bf16.mxu0 %vm464_vm6, %v1542_v17  ;;  %v3399_v45 = vpop.eup %3398 }
 0x753   :  { %3261 = vmatprep.subr.bf16.mxu0 %v3364_v52  ;;  %v1532_v9 = vmul.f32 %v3399_v45, %v3823_v22 }
 0x755   :  { %v1545_v54 = vpack.c.bf16 %v1533_v50, %v1532_v9 }
 0x756   :  { %3262 = vmatpush3.bf16.msra.mxu0 %v3364_v52 }
 0x757   :  { %3298 = vmatprep.subr.bf16.mxu0 %v5136_v59 }
 0x759   :  { %3264 = vmatmul.mubr.msk.bf16.vlgmr.msra.gmra.mxu0 %vm464_vm6, %v1543_v61 }
 0x75a   :  { %3267 = vmatprep.mubr.msk.bf16.mxu0 %vm464_vm6, %v1544_v10 }
 0x761   :  { %3268 = vmatmul.mubr.msk.bf16.gmra.mxu0 %vm464_vm6, %v1545_v54 }
 0x811   :  { %v1227_v12 = vpop.f32.mrf.mxu0 }
 0x812   :  { %v1228_v7 = vadd.f32 %v1227_v12, %v4030_v48  ;;  %v4072_v48 = vld [vmem:[%s5133_s2 + $0x5e] ss:$0 sm:$0xff] }
 0x813   :  { %v3237_v11 = vpop.f32.mrf.mxu0 }
 0x814   :  { %v1236_v4 = vrot.slane %v1228_v7, %v1072_v51 }
 0x815   :  { %v1230_v16 = vpop.f32.mrf.mxu0 }
 0x816   :  { %v1413_v60 = vmul.f32 %v4039_v20, %v1236_v4 }
 0x817   :  { %v3238_v23 = vpop.f32.mrf.mxu0 }
 0x818   :  { %v1422_v26 = vadd.f32 %v1413_v60, %v4004_v13  ;;  %v1423_v53 = vadd.f32 %v1413_v60, %v4008_v30  ;;  %v1424_v22 = vadd.f32 %v1413_v60, %v4002_v6  ;;  %v1425_v1 = vadd.f32 %v1413_v60, %v4006_v19 }
 0x819   :  { %v3265_v24 = vpop.f32.mrf.mxu0  ;;  %v1426_v47 = vadd.f32 %v1413_v60, %v4012_v40  ;;  %v1427_v51 = vadd.f32 %v1413_v60, %v4016_v44  ;;  %v1428_v13 = vadd.f32 %v1413_v60, %v4010_v27  ;;  %v1429_v6 = vadd.f32 %v1413_v60, %v4014_v43 }
 0x81a   :  { %v2852_v20 = vmul.f32 -1.442695, %v1422_v26  ;;  %v2853_v56 = vmul.f32 -1.442695, %v1423_v53  ;;  %v2854_v33 = vmul.f32 -1.442695, %v1424_v22  ;;  %v1639_v19 = vadd.f32 %v3265_v24, %v4072_v48 }
 0x81b   :  { %v1630_v30 = vpop.f32.mrf.mxu0  ;;  %v2855_v37 = vmul.f32 -1.442695, %v1425_v1  ;;  %v2856_v31 = vmul.f32 -1.442695, %v1426_v47  ;;  %v2857_v42 = vmul.f32 -1.442695, %v1427_v51 }
 0x81c   :  { %3400 = vpow2.f32 %v2852_v20  ;;  %v1631_v40 = vadd.f32 %v4072_v48, %v1630_v30  ;;  %v2858_v2 = vmul.f32 -1.442695, %v1428_v13  ;;  %v2859_v27 = vmul.f32 -1.442695, %v1429_v6  ;;  %v4130_v13 = vld [vmem:[%s5133_s2 + $0x8] sm:$0xff]  ;;  %v3513_v6 = vld [vmem:[%s5133_s2] sm:$0xff] }
 0x81d   :  { %v3266_v36 = vpop.f32.mrf.mxu0  ;;  %3402 = vpow2.f32 %v2853_v56  ;;  %v4081_v58 = vmax.f32 %v1639_v19, 0.0 }
 0x81e   :  { %v1642_v44 = vadd.f32 %v3266_v36, %v4072_v48  ;;  %3404 = vpow2.f32 %v2854_v33  ;;  %v4086_v55 = vmax.f32 %v1631_v40, 0.0 }
 0x81f   :  { %v1633_v49 = vpop.f32.mrf.mxu0  ;;  %3406 = vpow2.f32 %v2855_v37 }
 0x820   :  { %v4083_v18 = vmax.f32 %v1642_v44, 0.0  ;;  %v1634_v43 = vadd.f32 %v4072_v48, %v1633_v49  ;;  %3408 = vpow2.f32 %v2856_v31 }
 0x821   :  { %v3269_v63 = vpop.f32.mrf.mxu0  ;;  %3410 = vpow2.f32 %v2857_v42 }
 0x822   :  { %v1968_v52 = vpack.c.bf16 %v4083_v18, %v4081_v58  ;;  %v4090_v57 = vmax.f32 %v1634_v43, 0.0  ;;  %3412 = vpow2.f32 %v2858_v2  ;;  %v1655_v3 = vadd.f32 %v3269_v63, %v4072_v48 }
 0x823   :  { %v1646_v17 = vpop.f32.mrf.mxu0  ;;  %3414 = vpow2.f32 %v2859_v27 }
 0x824   :  { %v1967_v21 = vpack.c.bf16 %v4090_v57, %v4086_v55  ;;  %v1647_v14 = vadd.f32 %v4072_v48, %v1646_v17  ;;  %v4097_v5 = vmax.f32 %v1655_v3, 0.0 }
 0x825   :  { %v3270_v28 = vpop.f32.mrf.mxu0 }
 0x826   :  { %v1658_v15 = vadd.f32 %v3270_v28, %v4072_v48  ;;  %v4102_v45 = vmax.f32 %v1647_v14, 0.0 }
 0x827   :  { %v1649_v62 = vpop.f32.mrf.mxu0 }
 0x828   :  { %v4099_v8 = vmax.f32 %v1658_v15, 0.0  ;;  %v1650_v61 = vadd.f32 %v4072_v48, %v1649_v62 }
 0x829   :  { %v3401_v0 = vpop.eup %3400 }
 0x82a   :  { %v3403_v10 = vpop.eup %3402  ;;  %v1970_v50 = vpack.c.bf16 %v4099_v8, %v4097_v5  ;;  %v4106_v9 = vmax.f32 %v1650_v61, 0.0  ;;  %3279 = vmatprep.subr.mxu1 %v4099_v8  ;;  %v1486_v54 = vadd.f32 1.0, %v3401_v0 }
 0x82b   :  { %v3405_v12 = vpop.eup %3404  ;;  %3280 = vmatpush3.msra.mxu1 %v4099_v8  ;;  %v1487_v7 = vadd.f32 1.0, %v3403_v10 }
 0x82c   :  { %v3407_v11 = vpop.eup %3406  ;;  %v1969_v4 = vpack.c.bf16 %v4106_v9, %v4102_v45  ;;  %3281 = vmatprep.subr.mxu1 %v4097_v5  ;;  %3416 = vrcp.f32 %v1486_v54  ;;  %v1488_v16 = vadd.f32 1.0, %v3405_v12 }
 0x82d   :  { %v3409_v60 = vpop.eup %3408  ;;  %3282 = vmatpush3.msra.mxu1 %v4097_v5  ;;  %3418 = vrcp.f32 %v1487_v7  ;;  %v1489_v23 = vadd.f32 1.0, %v3407_v11 }
 0x82e   :  { %v3411_v26 = vpop.eup %3410  ;;  %3283 = vmatprep.subr.mxu1 %v4106_v9  ;;  %3420 = vrcp.f32 %v1488_v16  ;;  %v1490_v53 = vadd.f32 1.0, %v3409_v60 }
 0x82f   :  { %v3413_v22 = vpop.eup %3412  ;;  %3284 = vmatpush3.msra.mxu1 %v4106_v9  ;;  %3422 = vrcp.f32 %v1489_v23  ;;  %v1491_v1 = vadd.f32 1.0, %v3411_v26 }
 0x830   :  { %v3415_v24 = vpop.eup %3414  ;;  %3285 = vmatprep.subr.mxu1 %v4102_v45  ;;  %3424 = vrcp.f32 %v1490_v53  ;;  %v1492_v47 = vadd.f32 1.0, %v3413_v22 }
 0x831   :  { %3286 = vmatpush3.msra.mxu1 %v4102_v45  ;;  %3426 = vrcp.f32 %v1491_v1  ;;  %v1493_v51 = vadd.f32 1.0, %v3415_v24  ;;  %v4209_v45 = vld [vmem:[%s5133_s2 + $0x60] ss:$0 sm:$0xff] }
 0x832   :  { %3287 = vmatprep.subr.mxu1 %v4083_v18  ;;  %3428 = vrcp.f32 %v1492_v47 }
 0x833   :  { %3288 = vmatpush3.msra.mxu1 %v4083_v18  ;;  %3430 = vrcp.f32 %v1493_v51  ;;  %v4200_v18 = vand.u32 127, %v1070_v46 }
 0x834   :  { %3289 = vmatprep.subr.mxu1 %v4081_v58 }
 0x835   :  { %3290 = vmatpush3.msra.mxu1 %v4081_v58  ;;  %v3367_v58 = vld [vmem:[%s5131_s1 + $0x90] sm:$0xff]   ;;  %vm2132_vm8 = vcmp.ge.s32.totalorder %v4200_v18, 8  ;;  %vm2133_vm9 = vcmp.lt.s32.totalorder %v4200_v18, 11  ;;  %vm2218_vm10 = vcmp.ge.s32.totalorder %v4200_v18, 11  ;;  %vm2219_vm11 = vcmp.lt.s32.totalorder %v4200_v18, 14 }
 0x836   :  { %3291 = vmatprep.subr.mxu1 %v4090_v57  ;;  %vm4211_vm12 = vmand %vm2132_vm8, %vm2133_vm9  ;;  %vm2112_vm15 = vcmp.lt.s32.totalorder %v4200_v18, 8 }
 0x837   :  { %3292 = vmatpush3.msra.mxu1 %v4090_v57  ;;  %vm4215_vm13 = vmand %vm2218_vm10, %vm2219_vm11 }
 0x838   :  { %3293 = vmatprep.subr.mxu1 %v4086_v55 }
 0x839   :  { %v3417_v20 = vpop.eup %3416  ;;  %3294 = vmatpush3.msra.mxu1 %v4086_v55 }
 0x83a   :  { %v3419_v56 = vpop.eup %3418  ;;  %v1534_v33 = vmul.f32 %v3417_v20, %v3955_v39  ;;  %3296 = vmatmul.mubr.msk.f32.vlgmr.msra.gmra.mxu1 %vm359_vm4, %v4130_v13 }
 0x83b   :  { %v3421_v30 = vpop.eup %3420  ;;  %v1535_v37 = vmul.f32 %v3419_v56, %v3944_v34  ;;  %3320 = vmatprep.mubr.msk.f32.mxu1 %vm359_vm4, %v3513_v6  ;;  %v2879_v6 = vld [vmem:[%s5133_s2 + $0x5f] ss:$0 sm:$0xff] }
 0x83c   :  { %v3423_v19 = vpop.eup %3422  ;;  %v1536_v39 = vmul.f32 %v3421_v30, %v3938_v41 }
 0x83d   :  { %v3425_v31 = vpop.eup %3424  ;;  %v1546_v36 = vpack.c.bf16 %v1535_v37, %v1534_v33  ;;  %v1537_v42 = vmul.f32 %v3423_v19, %v3933_v38 }
 0x83e   :  { %v3427_v40 = vpop.eup %3426  ;;  %v1538_v44 = vmul.f32 %v3425_v31, %v3928_v35 }
 0x83f   :  { %v3429_v2 = vpop.eup %3428  ;;  %3271 = vmatprep.mubr.msk.bf16.mxu0 %vm464_vm6, %v1546_v36  ;;  %v1547_v34 = vpack.c.bf16 %v1537_v42, %v1536_v39  ;;  %v1539_v49 = vmul.f32 %v3427_v40, %v3922_v32  ;;  %v3365_v32 = vld [vmem:[%s5131_s1 + $0x70] sm:$0xff]  }
 0x840   :  { %v3431_v27 = vpop.eup %3430  ;;  %v1540_v43 = vmul.f32 %v3429_v2, %v3917_v29  ;;  %3299 = vmatpush3.bf16.msra.mxu0 %v3365_v32 }
 0x841   :  { %3272 = vmatmul.mubr.msk.bf16.gmra.mxu0 %vm464_vm6, %v1547_v34  ;;  %v1548_v63 = vpack.c.bf16 %v1539_v49, %v1538_v44  ;;  %v1541_v41 = vmul.f32 %v3431_v27, %v3909_v25  ;;  %3323 = vmatprep.subr.bf16.mxu0 %v5136_v59 }
 0x843   :  { %3275 = vmatprep.mubr.msk.bf16.mxu0 %vm464_vm6, %v1548_v63  ;;  %v1549_v38 = vpack.c.bf16 %v1541_v41, %v1540_v43 }
 0x849   :  { %3276 = vmatmul.mubr.msk.bf16.gmra.mxu0 %vm464_vm6, %v1549_v38 }
 0x84a   :  { %3300 = vmatprep.mubr.msk.bf16.mxu0 %vm3515_vm5, %v5136_v59 }
 0x8fa   :  { %v3297_v29 = vpop.f32.mrf.mxu1 }
 0x8fc   :  { %v1775_v35 = vpop.f32.mrf.mxu1 }
 0x8fd   :  { %v1784_v17 = vpack.c.bf16 %v3297_v29, %v1775_v35 }
 0x8ff   :  { %3301 = vmatmul.mubr.msk.bf16.vlgmr.msra.gmra.mxu0 %vm511_vm7, %v1784_v17 }
 0x900   :  { %3324 = vmatpush3.bf16.msra.mxu0 %v3365_v32  ;;  %3325 = vmatprep.mubr.msk.bf16.mxu0 %vm3515_vm5, %v5136_v59 }
 0x901   :  { %v3273_v25 = vpop.f32.mrf.mxu0 }
 0x902   :  { %v1671_v28 = vadd.f32 %v3273_v25, %v4072_v48 }
 0x903   :  { %v1662_v3 = vpop.f32.mrf.mxu0 }
 0x904   :  { %v1663_v15 = vadd.f32 %v4072_v48, %v1662_v3  ;;  %v1703_v0 = vmax.f32 %v1671_v28, 0.0 }
 0x905   :  { %v3274_v14 = vpop.f32.mrf.mxu0 }
 0x906   :  { %v1674_v62 = vadd.f32 %v3274_v14, %v4072_v48  ;;  %v1701_v7 = vmax.f32 %v1663_v15, 0.0 }
 0x907   :  { %v1665_v61 = vpop.f32.mrf.mxu0 }
 0x908   :  { %v1704_v10 = vmax.f32 %v1674_v62, 0.0  ;;  %v1666_v54 = vadd.f32 %v4072_v48, %v1665_v61 }
 0x909   :  { %v3277_v12 = vpop.f32.mrf.mxu0 }
 0x90a   :  { %v1972_v11 = vpack.c.bf16 %v1704_v10, %v1703_v0  ;;  %v1702_v16 = vmax.f32 %v1666_v54, 0.0  ;;  %v1687_v26 = vadd.f32 %v3277_v12, %v4072_v48 }
 0x90b   :  { %v1678_v60 = vpop.f32.mrf.mxu0 }
 0x90c   :  { %v1971_v23 = vpack.c.bf16 %v1702_v16, %v1701_v7  ;;  %v1679_v22 = vadd.f32 %v4072_v48, %v1678_v60  ;;  %v1707_v47 = vmax.f32 %v1687_v26, 0.0 }
 0x90d   :  { %v3278_v53 = vpop.f32.mrf.mxu0 }
 0x90e   :  { %v1690_v1 = vadd.f32 %v3278_v53, %v4072_v48  ;;  %v1705_v56 = vmax.f32 %v1679_v22, 0.0 }
 0x90f   :  { %v1681_v24 = vpop.f32.mrf.mxu0 }
 0x910   :  { %v1708_v51 = vmax.f32 %v1690_v1, 0.0  ;;  %v1682_v20 = vadd.f32 %v4072_v48, %v1681_v24  ;;  %v3366_v48 = vld [vmem:[%s5131_s1 + $0x80] sm:$0xff]  }
 0x911   :  { %3329 = vmatprep.subr.bf16.mxu0 %v3366_v48 }
 0x912   :  { %v1974_v33 = vpack.c.bf16 %v1708_v51, %v1707_v47  ;;  %v1706_v30 = vmax.f32 %v1682_v20, 0.0  ;;  %3304 = vmatprep.subr.mxu1 %v1708_v51 }
 0x913   :  { %3305 = vmatpush3.msra.mxu1 %v1708_v51 }
 0x914   :  { %v1973_v37 = vpack.c.bf16 %v1706_v30, %v1705_v56  ;;  %3306 = vmatprep.subr.mxu1 %v1707_v47 }
 0x915   :  { %3307 = vmatpush3.msra.mxu1 %v1707_v47 }
 0x916   :  { %3308 = vmatprep.subr.mxu1 %v1706_v30 }
 0x917   :  { %3309 = vmatpush3.msra.mxu1 %v1706_v30 }
 0x918   :  { %3310 = vmatprep.subr.mxu1 %v1705_v56 }
 0x919   :  { %3311 = vmatpush3.msra.mxu1 %v1705_v56 }
 0x91a   :  { %3312 = vmatprep.subr.mxu1 %v1704_v10 }
 0x91b   :  { %3313 = vmatpush3.msra.mxu1 %v1704_v10 }
 0x91c   :  { %3314 = vmatprep.subr.mxu1 %v1703_v0 }
 0x91d   :  { %3315 = vmatpush3.msra.mxu1 %v1703_v0 }
 0x91e   :  { %3316 = vmatprep.subr.mxu1 %v1702_v16 }
 0x91f   :  { %3317 = vmatpush3.msra.mxu1 %v1702_v16 }
 0x920   :  { %3318 = vmatprep.subr.mxu1 %v1701_v7 }
 0x921   :  { %3319 = vmatpush3.msra.mxu1 %v1701_v7 }
 0x922   :  { %3321 = vmatmul.mubr.msk.f32.vlgmr.msra.gmra.mxu1 %vm359_vm4, %v4130_v13  ;;  %3347 = vmatprep.subr.bf16.mxu1 %v3367_v58 }
 0x923   :  { %3348 = vmatpush3.bf16.msra.mxu1 %v3367_v58 }
 0x9bf   :  { %v1836_v19 = vpop.f32.mrf.mxu0 }
 0x9c0   :  { %v1837_v39 = vadd.f32 %v2879_v6, %v1836_v19 }
 0x9c1   :  { %v3302_v31 = vpop.f32.mrf.mxu0 }
 0x9c2   :  { %v1843_v42 = vmax.f32 %v1837_v39, 0.0 }
 0x9c3   :  { %v1839_v36 = vpop.f32.mrf.mxu0 }
 0x9c4   :  { %v1840_v40 = vadd.f32 %v2879_v6, %v1839_v36 }
 0x9c5   :  { %v3303_v44 = vpop.f32.mrf.mxu0 }
 0x9c6   :  { %v1844_v2 = vmax.f32 %v1840_v40, 0.0 }
 0x9c8   :  { %v2575_v34 = vpack.c.bf16 %v1844_v2, %v1843_v42 }
 0x9ca   :  { %3349 = vmatprep.mubr.msk.bf16.mxu1 %vm511_vm7, %v2575_v34 }
 0x9e2   :  { %v3322_v13 = vpop.f32.mrf.mxu1 }
 0x9e4   :  { %v1911_v49 = vpop.f32.mrf.mxu1 }
 0x9e5   :  { %v1920_v27 = vpack.c.bf16 %v3322_v13, %v1911_v49 }
 0x9e7   :  { %3326 = vmatmul.mubr.msk.bf16.vlgmr.msra.gmra.mxu0 %vm511_vm7, %v1920_v27 }
 0x9e8   :  { %3331 = vmatprep.mubr.msk.bf16.mxu0 %vm511_vm7, %v1967_v21  ;;  %3330 = vmatpush3.bf16.msra.mxu0 %v3366_v48 }
 0x9ef   :  { %3332 = vmatmul.mubr.msk.bf16.vlgmr.msra.gmra.mxu0 %vm511_vm7, %v1968_v52 }
 0x9f0   :  { %3335 = vmatprep.mubr.msk.bf16.mxu0 %vm511_vm7, %v1969_v4 }
 0x9f7   :  { %3336 = vmatmul.mubr.msk.bf16.gmra.mxu0 %vm511_vm7, %v1970_v50 }
 0x9f8   :  { %3339 = vmatprep.mubr.msk.bf16.mxu0 %vm511_vm7, %v1971_v23 }
 0x9ff   :  { %3340 = vmatmul.mubr.msk.bf16.gmra.mxu0 %vm511_vm7, %v1972_v11 }
 0xa00   :  { %3343 = vmatprep.mubr.msk.bf16.mxu0 %vm511_vm7, %v1973_v37 }
 0xa07   :  { %3344 = vmatmul.mubr.msk.bf16.gmra.mxu0 %vm511_vm7, %v1974_v33 }
 0xaa7   :  { %v1958_v55 = vpop.f32.mrf.mxu0 }
 0xaa8   :  { %v1959_v57 = vadd.f32 %v2879_v6, %v1958_v55 }
 0xaa9   :  { %v3327_v52 = vpop.f32.mrf.mxu0 }
 0xaaa   :  { %v1965_v50 = vmax.f32 %v1959_v57, 0.0 }
 0xaab   :  { %v1961_v21 = vpop.f32.mrf.mxu0 }
 0xaac   :  { %v1962_v5 = vadd.f32 %v2879_v6, %v1961_v21 }
 0xaad   :  { %v3328_v8 = vpop.f32.mrf.mxu0 }
 0xaae   :  { %v1966_v9 = vmax.f32 %v1962_v5, 0.0 }
 0xaaf   :  { %v3333_v43 = vpop.f32.mrf.mxu0 }
 0xab0   :  { %v2576_v63 = vpack.c.bf16 %v1966_v9, %v1965_v50  ;;  %v4220_v41 = vadd.f32 %v3333_v43, %v4209_v45 }
 0xab1   :  { %v2047_v38 = vpop.f32.mrf.mxu0 }
 0xab2   :  { %v4223_v32 = vadd.f32 %v4209_v45, %v2047_v38  ;;  %3350 = vmatmul.mubr.msk.bf16.vlgmr.msra.gmra.mxu1 %vm511_vm7, %v2576_v63  ;;  %v2225_v29 = vsel %vm4215_vm13, %v4220_v41, -inf  ;;  %v2139_v35 = vsel %vm4211_vm12, %v4220_v41, -inf }
 0xab3   :  { %v3334_v17 = vpop.f32.mrf.mxu0  ;;  %v2245_v25 = vsel %vm2153_vm14, %v2225_v29, -inf  ;;  %v2160_v3 = vsel %vm2153_vm14, %v2139_v35, -inf }
 0xab4   :  { %v4235_v28 = vadd.f32 %v3334_v17, %v4209_v45  ;;  %2246 = vmax.xlane.f32.xlu0 %v2245_v25  ;;  %2161 = vmax.xlane.f32.xlu1 %v2160_v3  ;;  %v2137_v14 = vsel %vm4211_vm12, %v4223_v32, -inf  ;;  %v2223_v7 = vsel %vm4215_vm13, %v4223_v32, -inf }
 0xab5   :  { %v2050_v15 = vpop.f32.mrf.mxu0  ;;  %v2154_v10 = vsel %vm2153_vm14, %v2137_v14, -inf  ;;  %v2239_v23 = vsel %vm2153_vm14, %v2223_v7, -inf }
 0xab6   :  { %v2140_v62 = vsel %vm4211_vm12, %v4235_v28, -inf  ;;  %v4246_v54 = vadd.f32 %v4209_v45, %v2050_v15  ;;  %v2226_v12 = vsel %vm4215_vm13, %v4235_v28, -inf }
 0xab7   :  { %v3337_v61 = vpop.f32.mrf.mxu0  ;;  %v2163_v0 = vsel %vm2153_vm14, %v2140_v62, -inf  ;;  %v2248_v60 = vsel %vm2153_vm14, %v2226_v12, -inf }
 0xab8   :  { %2164 = vmax.xlane.f32.xlu1 %v2163_v0  ;;  %2155 = vmax.xlane.f32.xlu0 %v2154_v10  ;;  %v4257_v26 = vadd.f32 %v3337_v61, %v4209_v45  ;;  %v2224_v22 = vsel %vm4215_vm13, %v4246_v54, -inf  ;;  %v2138_v1 = vsel %vm4211_vm12, %v4246_v54, -inf }
 0xab9   :  { %v2063_v11 = vpop.f32.mrf.mxu0  ;;  %v2242_v47 = vsel %vm2153_vm14, %v2224_v22, -inf  ;;  %v2157_v51 = vsel %vm2153_vm14, %v2138_v1, -inf }
 0xaba   :  { %v2143_v56 = vsel %vm4211_vm12, %v4257_v26, -inf  ;;  %v4279_v48 = vadd.f32 %v4209_v45, %v2063_v11  ;;  %v2229_v39 = vsel %vm4215_vm13, %v4257_v26, -inf }
 0xabb   :  { %v3338_v16 = vpop.f32.mrf.mxu0  ;;  %v2172_v37 = vsel %vm2153_vm14, %v2143_v56, -inf  ;;  %v2257_v42 = vsel %vm2153_vm14, %v2229_v39, -inf }
 0xabc   :  { %v4260_v53 = vadd.f32 %v3338_v16, %v4209_v45  ;;  %2249 = vmax.xlane.f32.xlu1 %v2248_v60  ;;  %2240 = vmax.xlane.f32.xlu0 %v2239_v23  ;;  %v2141_v44 = vsel %vm4211_vm12, %v4279_v48, -inf  ;;  %v2227_v55 = vsel %vm4215_vm13, %v4279_v48, -inf }
 0xabd   :  { %v2066_v24 = vpop.f32.mrf.mxu0  ;;  %v2166_v13 = vsel %vm2153_vm14, %v2141_v44, -inf  ;;  %v2251_v21 = vsel %vm2153_vm14, %v2227_v55, -inf }
 0xabe   :  { %v2144_v20 = vsel %vm4211_vm12, %v4260_v53, -inf  ;;  %v4282_v6 = vadd.f32 %v4209_v45, %v2066_v24  ;;  %v2230_v19 = vsel %vm4215_vm13, %v4260_v53, -inf }
 0xabf   :  { %v3341_v33 = vpop.f32.mrf.mxu0  ;;  %v2175_v30 = vsel %vm2153_vm14, %v2144_v20, -inf  ;;  %v2260_v36 = vsel %vm2153_vm14, %v2230_v19, -inf }
 0xac0   :  { %2243 = vmax.xlane.f32.xlu1 %v2242_v47  ;;  %2158 = vmax.xlane.f32.xlu0 %v2157_v51  ;;  %v2142_v40 = vsel %vm4211_vm12, %v4282_v6, -inf  ;;  %v4301_v49 = vadd.f32 %v3341_v33, %v4209_v45  ;;  %v2228_v58 = vsel %vm4215_vm13, %v4282_v6, -inf }
 0xac1   :  { %v2079_v31 = vpop.f32.mrf.mxu0  ;;  %v2169_v34 = vsel %vm2153_vm14, %v2142_v40, -inf  ;;  %v2254_v57 = vsel %vm2153_vm14, %v2228_v58, -inf }
 0xac2   :  { %v2147_v8 = vsel %vm4211_vm12, %v4301_v49, -inf  ;;  %v4323_v63 = vadd.f32 %v4209_v45, %v2079_v31  ;;  %v2233_v35 = vsel %vm4215_vm13, %v4301_v49, -inf }
 0xac3   :  { %v3342_v2 = vpop.f32.mrf.mxu0  ;;  %v2184_v43 = vsel %vm2153_vm14, %v2147_v8, -inf  ;;  %v2269_v3 = vsel %vm2153_vm14, %v2233_v35, -inf }
 0xac4   :  { %2176 = vmax.xlane.f32.xlu1 %v2175_v30  ;;  %2173 = vmax.xlane.f32.xlu0 %v2172_v37  ;;  %v4304_v27 = vadd.f32 %v3342_v2, %v4209_v45  ;;  %v2145_v15 = vsel %vm4211_vm12, %v4323_v63, -inf  ;;  %v2231_v11 = vsel %vm4215_vm13, %v4323_v63, -inf }
 0xac5   :  { %v2082_v52 = vpop.f32.mrf.mxu0  ;;  %v2178_v0 = vsel %vm2153_vm14, %v2145_v15, -inf  ;;  %v2263_v60 = vsel %vm2153_vm14, %v2231_v11, -inf }
 0xac6   :  { %v2148_v5 = vsel %vm4211_vm12, %v4304_v27, -inf  ;;  %v4326_v38 = vadd.f32 %v4209_v45, %v2082_v52  ;;  %v2234_v29 = vsel %vm4215_vm13, %v4304_v27, -inf }
 0xac7   :  { %v3345_v50 = vpop.f32.mrf.mxu0  ;;  %v2187_v9 = vsel %vm2153_vm14, %v2148_v5, -inf  ;;  %v2272_v25 = vsel %vm2153_vm14, %v2234_v29, -inf }
 0xac8   :  { %2261 = vmax.xlane.f32.xlu1 %v2260_v36  ;;  %2258 = vmax.xlane.f32.xlu0 %v2257_v42  ;;  %v2146_v14 = vsel %vm4211_vm12, %v4326_v38, -inf  ;;  %v4345_v10 = vadd.f32 %v3345_v50, %v4209_v45  ;;  %v2232_v7 = vsel %vm4215_vm13, %v4326_v38, -inf }
 0xac9   :  { %v2095_v17 = vpop.f32.mrf.mxu0  ;;  %v2181_v61 = vsel %vm2153_vm14, %v2146_v14, -inf  ;;  %v2266_v16 = vsel %vm2153_vm14, %v2232_v7, -inf }
 0xaca   :  { %v2151_v22 = vsel %vm4211_vm12, %v4345_v10, -inf  ;;  %v4367_v51 = vadd.f32 %v4209_v45, %v2095_v17  ;;  %v2237_v33 = vsel %vm4215_vm13, %v4345_v10, -inf }
 0xacb   :  { %v3346_v62 = vpop.f32.mrf.mxu0  ;;  %v2196_v47 = vsel %vm2153_vm14, %v2151_v22, -inf  ;;  %v2281_v37 = vsel %vm2153_vm14, %v2237_v33, -inf }
 0xacc   :  { %2170 = vmax.xlane.f32.xlu1 %v2169_v34  ;;  %2167 = vmax.xlane.f32.xlu0 %v2166_v13  ;;  %v4348_v12 = vadd.f32 %v3346_v62, %v4209_v45  ;;  %v2149_v19 = vsel %vm4211_vm12, %v4367_v51, -inf  ;;  %v2235_v42 = vsel %vm4215_vm13, %v4367_v51, -inf  ;;  %v2115_v62 = vsel %vm2112_vm15, %v4223_v32, 0.0 }
 0xacd   :  { %v2098_v1 = vpop.f32.mrf.mxu0  ;;  %v2190_v31 = vsel %vm2153_vm14, %v2149_v19, -inf  ;;  %v2275_v44 = vsel %vm2153_vm14, %v2235_v42, -inf  ;;  %v2119_v42 = vsel %vm2112_vm15, %v4279_v48, 0.0 }
 0xace   :  { %v2152_v23 = vsel %vm4211_vm12, %v4348_v12, -inf  ;;  %v4370_v20 = vadd.f32 %v4209_v45, %v2098_v1  ;;  %v2238_v56 = vsel %vm4215_vm13, %v4348_v12, -inf }
 0xacf   :  { %v2199_v24 = vsel %vm2153_vm14, %v2152_v23, -inf  ;;  %v2284_v30 = vsel %vm2153_vm14, %v2238_v56, -inf  ;;  %v2116_v23 = vsel %vm2112_vm15, %v4246_v54, 0.0 }
 0xad0   :  { %2255 = vmax.xlane.f32.xlu1 %v2254_v57  ;;  %2252 = vmax.xlane.f32.xlu0 %v2251_v21  ;;  %v2150_v45 = vsel %vm4211_vm12, %v4370_v20, -inf  ;;  %v2236_v36 = vsel %vm4215_vm13, %v4370_v20, -inf }
 0xad1   :  { %v2193_v39 = vsel %vm2153_vm14, %v2150_v45, -inf  ;;  %v2278_v40 = vsel %vm2153_vm14, %v2236_v36, -inf }
 0xad4   :  { %2188 = vmax.xlane.f32.xlu1 %v2187_v9  ;;  %2185 = vmax.xlane.f32.xlu0 %v2184_v43 }
 0xad8   :  { %2273 = vmax.xlane.f32.xlu1 %v2272_v25  ;;  %2270 = vmax.xlane.f32.xlu0 %v2269_v3 }
 0xadc   :  { %2182 = vmax.xlane.f32.xlu1 %v2181_v61  ;;  %2179 = vmax.xlane.f32.xlu0 %v2178_v0  ;;  %v2117_v61 = vsel %vm2112_vm15, %v4220_v41, 0.0 }
 0xae0   :  { %2267 = vmax.xlane.f32.xlu1 %v2266_v16  ;;  %2264 = vmax.xlane.f32.xlu0 %v2263_v60 }
 0xae4   :  { %2200 = vmax.xlane.f32.xlu1 %v2199_v24  ;;  %2197 = vmax.xlane.f32.xlu0 %v2196_v47 }
 0xae8   :  { %2285 = vmax.xlane.f32.xlu1 %v2284_v30  ;;  %2282 = vmax.xlane.f32.xlu0 %v2281_v37  ;;  %v2118_v30 = vsel %vm2112_vm15, %v4235_v28, 0.0 }
 0xaec   :  { %2194 = vmax.xlane.f32.xlu1 %v2193_v39  ;;  %2191 = vmax.xlane.f32.xlu0 %v2190_v31 }
 0xaf0   :  { %2279 = vmax.xlane.f32.xlu1 %v2278_v40  ;;  %2276 = vmax.xlane.f32.xlu0 %v2275_v44  ;;  %v2121_v40 = vsel %vm2112_vm15, %v4257_v26, 0.0 }
 0xb3d   :  { %v2247_v2 = vpop.xlane.xlu0 %2246  ;;  %v2162_v34 = vpop.xlane.xlu1 %2161 }
 0xb3e   :  { %v2204_v16 = vsel %vm4211_vm12, %v2162_v34, %v2117_v61  ;;  %v2125_v61 = vsel %vm2112_vm15, %v4301_v49, 0.0 }
 0xb3f   :  { %v2289_v1 = vsel %vm4215_vm13, %v2247_v2, %v2204_v16 }
 0xb40   :  { %v2305_v37 = vsub.f32 %v4220_v41, %v2289_v1 }
 0xb41   :  { %v2165_v13 = vpop.xlane.xlu1 %2164  ;;  %v2156_v58 = vpop.xlane.xlu0 %2155 }
 0xb42   :  { %v2202_v0 = vsel %vm4211_vm12, %v2156_v58, %v2115_v62  ;;  %v2205_v45 = vsel %vm4211_vm12, %v2165_v13, %v2118_v30  ;;  %v2323_v34 = vmul.f32 1.442695, %v2305_v37 }
 0xb45   :  { %v2250_v55 = vpop.xlane.xlu1 %2249  ;;  %v2241_v52 = vpop.xlane.xlu0 %2240 }
 0xb46   :  { %v2287_v60 = vsel %vm4215_vm13, %v2241_v52, %v2202_v0  ;;  %v2290_v19 = vsel %vm4215_vm13, %v2250_v55, %v2205_v45  ;;  %v2899_v52 = vld [vmem:[%s5133_s2 + $0x61] ss:$0 sm:$0xff] }
 0xb47   :  { %v2303_v24 = vsub.f32 %v4223_v32, %v2287_v60  ;;  %v2306_v13 = vsub.f32 %v4235_v28, %v2290_v19  ;;  %v2123_v60 = vsel %vm2112_vm15, %v4323_v63, 0.0 }
 0xb49   :  { %v2244_v57 = vpop.xlane.xlu1 %2243  ;;  %v2159_v21 = vpop.xlane.xlu0 %2158  ;;  %v2319_v39 = vmul.f32 1.442695, %v2303_v24 }
 0xb4a   :  { %v2203_v22 = vsel %vm4211_vm12, %v2159_v21, %v2116_v23 }
 0xb4b   :  { %v2288_v33 = vsel %vm4215_vm13, %v2244_v57, %v2203_v22  ;;  %3432 = vpow2.f32 %v2319_v39  ;;  %v2325_v22 = vmul.f32 1.442695, %v2306_v13 }
 0xb4c   :  { %v2304_v31 = vsub.f32 %v4246_v54, %v2288_v33  ;;  %3434 = vpow2.f32 %v2323_v34 }
 0xb4d   :  { %v4396_v5 = vpop.xlane.xlu1 %2176  ;;  %v2174_v8 = vpop.xlane.xlu0 %2173 }
 0xb4e   :  { %v2208_v58 = vsel %vm4211_vm12, %v2174_v8, %v2121_v40  ;;  %v2321_v57 = vmul.f32 1.442695, %v2304_v31  ;;  %v2122_v8 = vsel %vm2112_vm15, %v4260_v53, 0.0 }
 0xb50   :  { %3436 = vpow2.f32 %v2321_v57 }
 0xb51   :  { %v2262_v50 = vpop.xlane.xlu1 %2261  ;;  %v2259_v9 = vpop.xlane.xlu0 %2258  ;;  %3438 = vpow2.f32 %v2325_v22 }
 0xb52   :  { %v2293_v21 = vsel %vm4215_vm13, %v2259_v9, %v2208_v58 }
 0xb53   :  { %v2309_v1 = vsub.f32 %v4257_v26, %v2293_v21 }
 0xb55   :  { %v2171_v43 = vpop.xlane.xlu1 %2170  ;;  %v2168_v29 = vpop.xlane.xlu0 %2167  ;;  %v2331_v58 = vmul.f32 1.442695, %v2309_v1 }
 0xb56   :  { %v2206_v44 = vsel %vm4211_vm12, %v2168_v29, %v2119_v42  ;;  %v2120_v29 = vsel %vm2112_vm15, %v4282_v6, 0.0 }
 0xb59   :  { %v2256_v35 = vpop.xlane.xlu1 %2255  ;;  %v2253_v17 = vpop.xlane.xlu0 %2252 }
 0xb5a   :  { %v2291_v55 = vsel %vm4215_vm13, %v2253_v17, %v2206_v44  ;;  %v2207_v17 = vsel %vm4211_vm12, %v2171_v43, %v2120_v29  ;;  %v2209_v43 = vsel %vm4211_vm12, %v4396_v5, %v2122_v8  ;;  %v2124_v5 = vsel %vm2112_vm15, %v4326_v38, 0.0 }
 0xb5b   :  { %v2292_v9 = vsel %vm4215_vm13, %v2256_v35, %v2207_v17  ;;  %v2307_v16 = vsub.f32 %v4279_v48, %v2291_v55  ;;  %v2294_v35 = vsel %vm4215_vm13, %v2262_v50, %v2209_v43 }
 0xb5c   :  { %v2308_v45 = vsub.f32 %v4282_v6, %v2292_v9  ;;  %v2310_v13 = vsub.f32 %v4260_v53, %v2294_v35  ;;  %v2126_v9 = vsel %vm2112_vm15, %v4304_v27, 0.0 }
 0xb5d   :  { %v4398_v25 = vpop.xlane.xlu1 %2188  ;;  %v4400_v3 = vpop.xlane.xlu0 %2185  ;;  %v2327_v31 = vmul.f32 1.442695, %v2307_v16  ;;  %v2127_v16 = vsel %vm2112_vm15, %v4367_v51, 0.0 }
 0xb5f   :  { %3440 = vpow2.f32 %v2327_v31 }
 0xb60   :  { %3442 = vpow2.f32 %v2331_v58 }
 0xb61   :  { %v4402_v14 = vpop.xlane.xlu1 %2273  ;;  %v4404_v15 = vpop.xlane.xlu0 %2270 }
 0xb65   :  { %v4415_v7 = vpop.xlane.xlu1 %2182  ;;  %v2180_v11 = vpop.xlane.xlu0 %2179 }
 0xb66   :  { %v2210_v19 = vsel %vm4211_vm12, %v2180_v11, %v2123_v60  ;;  %v2212_v11 = vsel %vm4211_vm12, %v4400_v3, %v2125_v61  ;;  %v2211_v57 = vsel %vm4211_vm12, %v4415_v7, %v2124_v5  ;;  %v2329_v61 = vmul.f32 1.442695, %v2308_v45 }
 0xb67   :  { %v2213_v60 = vsel %vm4211_vm12, %v4398_v25, %v2126_v9 }
 0xb68   :  { %v2298_v35 = vsel %vm4215_vm13, %v4402_v14, %v2213_v60  ;;  %3444 = vpow2.f32 %v2329_v61  ;;  %v2129_v14 = vsel %vm2112_vm15, %v4345_v10, 0.0 }
 0xb69   :  { %v4429_v47 = vpop.xlane.xlu1 %2267  ;;  %v2265_v56 = vpop.xlane.xlu0 %2264 }
 0xb6a   :  { %v2295_v42 = vsel %vm4215_vm13, %v2265_v56, %v2210_v19  ;;  %v2297_v56 = vsel %vm4215_vm13, %v4404_v15, %v2212_v11  ;;  %v2296_v8 = vsel %vm4215_vm13, %v4429_v47, %v2211_v57  ;;  %v2333_v47 = vmul.f32 1.442695, %v2310_v13 }
 0xb6b   :  { %v2311_v3 = vsub.f32 %v4323_v63, %v2295_v42  ;;  %v2313_v22 = vsub.f32 %v4301_v49, %v2297_v56  ;;  %v2312_v43 = vsub.f32 %v4326_v38, %v2296_v8 }
 0xb6c   :  { %3446 = vpow2.f32 %v2333_v47 }
 0xb6d   :  { %v4442_v36 = vpop.xlane.xlu0 %2197  ;;  %v4452_v2 = vpop.xlane.xlu1 %2200  ;;  %v2337_v13 = vmul.f32 1.442695, %v2312_v43 }
 0xb6e   :  { %v2216_v56 = vsel %vm4211_vm12, %v4442_v36, %v2129_v14 }
 0xb71   :  { %v4467_v62 = vpop.xlane.xlu0 %2282  ;;  %v4491_v33 = vpop.xlane.xlu1 %2285 }
 0xb72   :  { %v3351_v0 = vpop.f32.mrf.mxu1  ;;  %v2301_v8 = vsel %vm4215_vm13, %v4467_v62, %v2216_v56  ;;  %v2130_v62 = vsel %vm2112_vm15, %v4348_v12, 0.0 }
 0xb73   :  { %v4483_v23 = vadd.f32 %v3351_v0, %v2899_v52  ;;  %v2317_v9 = vsub.f32 %v4345_v10, %v2301_v8  ;;  %v2217_v60 = vsel %vm4211_vm12, %v4452_v2, %v2130_v62 }
 0xb74   :  { %v2631_v24 = vpop.f32.mrf.mxu1 }
 0xb75   :  { %5146 = vst [vmem:[#allocation2_spill] sm:$0xff] %v4483_v23  ;;  %v4493_v30 = vadd.f32 %v2899_v52, %v2631_v24  ;;  %v2652_v37 = vsel %vm4211_vm12, %v4483_v23, -inf  ;;  %v2192_v40 = vpop.xlane.xlu0 %2191  ;;  %v2195_v0 = vpop.xlane.xlu1 %2194 }
 0xb76   :  { %v3352_v39 = vpop.f32.mrf.mxu1  ;;  %v2660_v50 = vsel %vm2153_vm14, %v2652_v37, -inf  ;;  %v4550_v24 = vpop.eup %3432  ;;  %v2335_v37 = vmul.f32 1.442695, %v2311_v3  ;;  %v2214_v25 = vsel %vm4211_vm12, %v2192_v40, %v2127_v16  ;;  %v2314_v40 = vsub.f32 %v4304_v27, %v2298_v35 }
 0xb77   :  { %v4507_v44 = vadd.f32 %v3352_v39, %v2899_v52  ;;  %2661 = vmax.xlane.f32.xlu0 %v2660_v50  ;;  %v2650_v34 = vsel %vm4211_vm12, %v4493_v30, -inf  ;;  %v2672_v39 = vsel %vm4215_vm13, %v4483_v23, -inf  ;;  %v2128_v50 = vsel %vm2112_vm15, %v4370_v20, 0.0  ;;  %v4573_v42 = vpop.eup %3434 }
 0xb78   :  { %v2634_v55 = vpop.f32.mrf.mxu1  ;;  %v2654_v15 = vsel %vm2153_vm14, %v2650_v34, -inf  ;;  %v2339_v34 = vmul.f32 1.442695, %v2313_v22  ;;  %v2351_v11 = vsel %vm4211_vm12, %v4550_v24, 0.0  ;;  %3448 = vpow2.f32 %v2335_v37 }
 0xb79   :  { %5147 = vst [vmem:[#allocation3_spill] sm:$0xff] %v4507_v44  ;;  %v4522_v21 = vadd.f32 %v2899_v52, %v2634_v55  ;;  %v2653_v29 = vsel %vm4211_vm12, %v4507_v44, -inf  ;;  %v2670_v52 = vsel %vm4215_vm13, %v4493_v30, -inf  ;;  %v2277_v1 = vpop.xlane.xlu0 %2276  ;;  %v2280_v58 = vpop.xlane.xlu1 %2279  ;;  %v2215_v3 = vsel %vm4211_vm12, %v2195_v0, %v2128_v50 }
 0xb7a   :  { %v2663_v17 = vsel %vm2153_vm14, %v2653_v29, -inf  ;;  %v2674_v5 = vsel %vm2153_vm14, %v2670_v52, -inf  ;;  %v2299_v31 = vsel %vm4215_vm13, %v2277_v1, %v2214_v25  ;;  %v4579_v55 = vpop.eup %3436  ;;  %v2680_v29 = vsel %vm2153_vm14, %v2672_v39, -inf }
 0xb7b   :  { %5148 = vst [vmem:[#allocation4_spill] sm:$0xff] %v4522_v21  ;;  %2664 = vmax.xlane.f32.xlu1 %v2663_v17  ;;  %2655 = vmax.xlane.f32.xlu0 %v2654_v15  ;;  %v2651_v7 = vsel %vm4211_vm12, %v4522_v21, -inf  ;;  %v2671_v19 = vsel %vm4215_vm13, %v4522_v21, -inf  ;;  %v2315_v17 = vsub.f32 %v4367_v51, %v2299_v31  ;;  %v2673_v15 = vsel %vm4215_vm13, %v4507_v44, -inf  ;;  %v4597_v61 = vpop.eup %3438 }
 0xb7c   :  { %v2657_v45 = vsel %vm2153_vm14, %v2651_v7, -inf  ;;  %v2677_v57 = vsel %vm2153_vm14, %v2671_v19, -inf  ;;  %v2300_v36 = vsel %vm4215_vm13, %v2280_v58, %v2215_v3  ;;  %v2367_v7 = vsel %vm2153_vm14, %v2351_v11, 0.0  ;;  %v4615_v1 = vpop.eup %3440 }
 0xb7d   :  { %v2352_v0 = vsel %vm4211_vm12, %v4579_v55, 0.0  ;;  %v2353_v52 = vsel %vm4211_vm12, %v4573_v42, 0.0  ;;  %v2341_v47 = vmul.f32 1.442695, %v2314_v40  ;;  %3450 = vpow2.f32 %v2339_v34 }
 0xb7e   :  { %v2683_v16 = vsel %vm2153_vm14, %v2673_v15, -inf  ;;  %3452 = vpow2.f32 %v2337_v13  ;;  %v2316_v22 = vsub.f32 %v4370_v20, %v2300_v36  ;;  %v2343_v43 = vmul.f32 1.442695, %v2315_v17 }
 0xb7f   :  { %2658 = vmax.xlane.f32.xlu1 %v2657_v45  ;;  %2675 = vmax.xlane.f32.xlu0 %v2674_v5  ;;  %v2302_v35 = vsel %vm4215_vm13, %v4491_v33, %v2217_v60  ;;  %v2373_v37 = vsel %vm2153_vm14, %v2353_v52, 0.0  ;;  %v4621_v45 = vpop.eup %3442  ;;  %3454 = vpow2.f32 %v2341_v47  ;;  %v2347_v5 = vmul.f32 1.442695, %v2317_v9 }
 0xb80   :  { %v2370_v25 = vsel %vm2153_vm14, %v2352_v0, 0.0  ;;  %v2354_v2 = vsel %vm4211_vm12, %v4597_v61, 0.0  ;;  %v2318_v19 = vsub.f32 %v4348_v12, %v2302_v35  ;;  %v2345_v39 = vmul.f32 1.442695, %v2316_v22  ;;  %v4631_v14 = vpop.eup %3444 }
 0xb81   :  { %3456 = vpow2.f32 %v2343_v43  ;;  %v2355_v33 = vsel %vm4211_vm12, %v4615_v1, 0.0  ;;  %v4633_v50 = vpop.eup %3446  ;;  %v2376_v31 = vsel %vm2153_vm14, %v2354_v2, 0.0  ;;  %v2356_v58 = vsel %vm4211_vm12, %v4631_v14, 0.0 }
 0xb82   :  { %3458 = vpow2.f32 %v2347_v5  ;;  %v2379_v40 = vsel %vm2153_vm14, %v2355_v33, 0.0  ;;  %v2349_v13 = vmul.f32 1.442695, %v2318_v19  ;;  %v2357_v11 = vsel %vm4211_vm12, %v4621_v45, 0.0 }
 0xb83   :  { %2678 = vmax.xlane.f32.xlu1 %v2677_v57  ;;  %2681 = vmax.xlane.f32.xlu0 %v2680_v29  ;;  %3460 = vpow2.f32 %v2345_v39  ;;  %v2382_v56 = vsel %vm2153_vm14, %v2356_v58, 0.0  ;;  %v2385_v57 = vsel %vm2153_vm14, %v2357_v11, 0.0  ;;  %v2358_v8 = vsel %vm4211_vm12, %v4633_v50, 0.0 }
 0xb84   :  { %3462 = vpow2.f32 %v2349_v13  ;;  %v2388_v15 = vsel %vm2153_vm14, %v2358_v8, 0.0  ;;  %v2432_v58 = vsel %vm4215_vm13, %v4579_v55, 0.0  ;;  %v2433_v11 = vsel %vm4215_vm13, %v4573_v42, 0.0 }
 0xb85   :  { %v4637_v34 = vpop.eup %3448  ;;  %v2434_v8 = vsel %vm4215_vm13, %v4597_v61, 0.0 }
 0xb86   :  { %v2359_v3 = vsel %vm4211_vm12, %v4637_v34, 0.0 }
 0xb87   :  { %2684 = vmax.xlane.f32.xlu1 %v2683_v16  ;;  %2368 = vadd.xlane.f32.xlu0 %v2367_v7  ;;  %v2391_v36 = vsel %vm2153_vm14, %v2359_v3, 0.0  ;;  %v2435_v3 = vsel %vm4215_vm13, %v4615_v1, 0.0 }
 0xb8a   :  { %v4647_v29 = vpop.eup %3450 }
 0xb8b   :  { %2371 = vadd.xlane.f32.xlu1 %v2370_v25  ;;  %2374 = vadd.xlane.f32.xlu0 %v2373_v37  ;;  %v4655_v17 = vpop.eup %3452  ;;  %v2361_v0 = vsel %vm4211_vm12, %v4647_v29, 0.0 }
 0xb8c   :  { %v4659_v62 = vpop.eup %3454  ;;  %v2360_v7 = vsel %vm4211_vm12, %v4655_v17, 0.0  ;;  %v2397_v9 = vsel %vm2153_vm14, %v2361_v0, 0.0  ;;  %v2437_v0 = vsel %vm4215_vm13, %v4621_v45, 0.0 }
 0xb8d   :  { %v2394_v47 = vsel %vm2153_vm14, %v2360_v7, 0.0  ;;  %v2362_v60 = vsel %vm4211_vm12, %v4659_v62, 0.0  ;;  %v2436_v7 = vsel %vm4215_vm13, %v4631_v14, 0.0 }
 0xb8e   :  { %v4667_v52 = vpop.eup %3456  ;;  %v2400_v35 = vsel %vm2153_vm14, %v2362_v60, 0.0  ;;  %v2438_v60 = vsel %vm4215_vm13, %v4633_v50, 0.0 }
 0xb8f   :  { %2377 = vadd.xlane.f32.xlu1 %v2376_v31  ;;  %2380 = vadd.xlane.f32.xlu0 %v2379_v40  ;;  %v4671_v16 = vpop.eup %3458  ;;  %v2363_v22 = vsel %vm4211_vm12, %v4667_v52, 0.0  ;;  %v2431_v31 = vsel %vm4215_vm13, %v4550_v24, 0.0 }
 0xb90   :  { %v4679_v43 = vpop.eup %3460  ;;  %v2403_v37 = vsel %vm2153_vm14, %v2363_v22, 0.0  ;;  %v2365_v25 = vsel %vm4211_vm12, %v4671_v16, 0.0  ;;  %v2447_v13 = vsel %vm2153_vm14, %v2431_v31, 0.0  ;;  %v2439_v22 = vsel %vm4215_vm13, %v4637_v34, 0.0 }
 0xb91   :  { %v2364_v5 = vsel %vm4211_vm12, %v4679_v43, 0.0  ;;  %v4689_v2 = vpop.eup %3462  ;;  %v2409_v39 = vsel %vm2153_vm14, %v2365_v25, 0.0  ;;  %v2441_v25 = vsel %vm4215_vm13, %v4647_v29, 0.0  ;;  %v2443_v31 = vsel %vm4215_vm13, %v4667_v52, 0.0 }
 0xb92   :  { %v2406_v19 = vsel %vm2153_vm14, %v2364_v5, 0.0  ;;  %v2366_v33 = vsel %vm4211_vm12, %v4689_v2, 0.0  ;;  %v2440_v5 = vsel %vm4215_vm13, %v4655_v17, 0.0 }
 0xb93   :  { %2383 = vadd.xlane.f32.xlu1 %v2382_v56  ;;  %2386 = vadd.xlane.f32.xlu0 %v2385_v57  ;;  %v2412_v40 = vsel %vm2153_vm14, %v2366_v33, 0.0  ;;  %v2450_v56 = vsel %vm2153_vm14, %v2432_v58, 0.0  ;;  %v2453_v57 = vsel %vm2153_vm14, %v2433_v11, 0.0  ;;  %v2442_v33 = vsel %vm4215_vm13, %v4659_v62, 0.0 }
 0xb94   :  { %v2444_v58 = vsel %vm4215_vm13, %v4679_v43, 0.0  ;;  %v2445_v11 = vsel %vm4215_vm13, %v4671_v16, 0.0 }
 0xb97   :  { %2389 = vadd.xlane.f32.xlu1 %v2388_v15  ;;  %2392 = vadd.xlane.f32.xlu0 %v2391_v36  ;;  %v2456_v15 = vsel %vm2153_vm14, %v2434_v8, 0.0  ;;  %v2459_v36 = vsel %vm2153_vm14, %v2435_v3, 0.0  ;;  %v2446_v8 = vsel %vm4215_vm13, %v4689_v2, 0.0 }
 0xb98   :  { %v2492_v3 = vsel %vm2153_vm14, %v2446_v8, 0.0 }
 0xb9b   :  { %2395 = vadd.xlane.f32.xlu1 %v2394_v47  ;;  %2398 = vadd.xlane.f32.xlu0 %v2397_v9  ;;  %v2462_v47 = vsel %vm2153_vm14, %v2436_v7, 0.0  ;;  %v2465_v9 = vsel %vm2153_vm14, %v2437_v0, 0.0  ;;  %v2646_v0 = vsel %vm2112_vm15, %v4493_v30, 0.0 }
 0xb9f   :  { %2401 = vadd.xlane.f32.xlu1 %v2400_v35  ;;  %2404 = vadd.xlane.f32.xlu0 %v2403_v37  ;;  %v2468_v35 = vsel %vm2153_vm14, %v2438_v60, 0.0  ;;  %v2471_v37 = vsel %vm2153_vm14, %v2439_v22, 0.0 }
 0xba3   :  { %2407 = vadd.xlane.f32.xlu1 %v2406_v19  ;;  %2410 = vadd.xlane.f32.xlu0 %v2409_v39  ;;  %v2474_v19 = vsel %vm2153_vm14, %v2440_v5, 0.0  ;;  %v2477_v39 = vsel %vm2153_vm14, %v2441_v25, 0.0  ;;  %v2647_v5 = vsel %vm2112_vm15, %v4522_v21, 0.0 }
 0xba7   :  { %2413 = vadd.xlane.f32.xlu1 %v2412_v40  ;;  %2448 = vadd.xlane.f32.xlu0 %v2447_v13  ;;  %v2480_v40 = vsel %vm2153_vm14, %v2442_v33, 0.0  ;;  %v2483_v13 = vsel %vm2153_vm14, %v2443_v31, 0.0 }
 0xbab   :  { %2451 = vadd.xlane.f32.xlu1 %v2450_v56  ;;  %2454 = vadd.xlane.f32.xlu0 %v2453_v57  ;;  %v2486_v56 = vsel %vm2153_vm14, %v2444_v58, 0.0  ;;  %v2489_v57 = vsel %vm2153_vm14, %v2445_v11, 0.0 }
 0xbaf   :  { %2457 = vadd.xlane.f32.xlu1 %v2456_v15  ;;  %2460 = vadd.xlane.f32.xlu0 %v2459_v36 }
 0xbb3   :  { %2463 = vadd.xlane.f32.xlu1 %v2462_v47  ;;  %2466 = vadd.xlane.f32.xlu0 %v2465_v9 }
 0xbb7   :  { %2469 = vadd.xlane.f32.xlu1 %v2468_v35  ;;  %2472 = vadd.xlane.f32.xlu0 %v2471_v37  ;;  %v2648_v37 = vsel %vm2112_vm15, %v4483_v23, 0.0 }
 0xbbb   :  { %2475 = vadd.xlane.f32.xlu1 %v2474_v19  ;;  %2478 = vadd.xlane.f32.xlu0 %v2477_v39 }
 0xbbf   :  { %2481 = vadd.xlane.f32.xlu1 %v2480_v40  ;;  %2484 = vadd.xlane.f32.xlu0 %v2483_v13 }
 0xbc3   :  { %2487 = vadd.xlane.f32.xlu1 %v2486_v56  ;;  %2490 = vadd.xlane.f32.xlu0 %v2489_v57  ;;  %v2649_v56 = vsel %vm2112_vm15, %v4507_v44, 0.0 }
 0xbc7   :  { %2493 = vadd.xlane.f32.xlu1 %v2492_v3 }
 0xc00   :  { %v2662_v15 = vpop.xlane.xlu0 %2661 }
 0xc01   :  { %v2668_v25 = vsel %vm4211_vm12, %v2662_v15, %v2648_v37 }
 0xc04   :  { %v2665_v36 = vpop.xlane.xlu1 %2664  ;;  %v2656_v7 = vpop.xlane.xlu0 %2655 }
 0xc05   :  { %v2666_v47 = vsel %vm4211_vm12, %v2656_v7, %v2646_v0  ;;  %v2669_v57 = vsel %vm4211_vm12, %v2665_v36, %v2649_v56 }
 0xc08   :  { %v2659_v9 = vpop.xlane.xlu1 %2658  ;;  %v2676_v60 = vpop.xlane.xlu0 %2675 }
 0xc09   :  { %v2686_v22 = vsel %vm4215_vm13, %v2676_v60, %v2666_v47  ;;  %v2667_v19 = vsel %vm4211_vm12, %v2659_v9, %v2647_v5 }
 0xc0a   :  { %v2690_v35 = vsub.f32 %v4493_v30, %v2686_v22 }
 0xc0c   :  { %v2679_v39 = vpop.xlane.xlu1 %2678  ;;  %v2682_v33 = vpop.xlane.xlu0 %2681  ;;  %v2694_v13 = vmul.f32 1.442695, %v2690_v35 }
 0xc0d   :  { %v2687_v31 = vsel %vm4215_vm13, %v2679_v39, %v2667_v19  ;;  %v2688_v40 = vsel %vm4215_vm13, %v2682_v33, %v2668_v25 }
 0xc0e   :  { %v2691_v58 = vsub.f32 %v4522_v21, %v2687_v31  ;;  %v2692_v11 = vsub.f32 %v4483_v23, %v2688_v40  ;;  %3464 = vpow2.f32 %v2694_v13 }
 0xc10   :  { %v2698_v8 = vmul.f32 1.442695, %v2692_v11  ;;  %v2685_v3 = vpop.xlane.xlu1 %2684  ;;  %v2369_v15 = vpop.xlane.xlu0 %2368  ;;  %v2696_v7 = vmul.f32 1.442695, %v2691_v58 }
 0xc11   :  { %v2689_v0 = vsel %vm4215_vm13, %v2685_v3, %v2669_v57 }
 0xc12   :  { %v2693_v47 = vsub.f32 %v4507_v44, %v2689_v0  ;;  %3466 = vpow2.f32 %v2698_v8  ;;  %v5151_v44 = vmov 0.0  }
 0xc13   :  { %3468 = vpow2.f32 %v2696_v7 }
 0xc14   :  { %v2700_v9 = vmul.f32 1.442695, %v2693_v47  ;;  %v2372_v60 = vpop.xlane.xlu1 %2371  ;;  %v2375_v22 = vpop.xlane.xlu0 %2374 }
 0xc16   :  { %3470 = vpow2.f32 %v2700_v9 }
 0xc18   :  { %v2378_v35 = vpop.xlane.xlu1 %2377  ;;  %v2381_v37 = vpop.xlane.xlu0 %2380 }
 0xc1b   :  { %v4797_v25 = vpop.eup %3464 }
 0xc1c   :  { %v4793_v5 = vpop.xlane.xlu1 %2383  ;;  %v4795_v36 = vpop.xlane.xlu0 %2386  ;;  %v2702_v11 = vsel %vm4211_vm12, %v4797_v25, 0.0  ;;  %v2722_v47 = vsel %vm4215_vm13, %v4797_v25, 0.0 }
 0xc1d   :  { %v2706_v7 = vsel %vm2153_vm14, %v2702_v11, 0.0 }
 0xc1f   :  { %v4799_v19 = vpop.eup %3466 }
 0xc20   :  { %5149 = vst [vmem:[#allocation5_spill] sm:$0xff] %v4799_v19  ;;  %v4801_v39 = vpop.xlane.xlu1 %2389  ;;  %v4803_v33 = vpop.xlane.xlu0 %2392  ;;  %v2704_v31 = vsel %vm4211_vm12, %v4799_v19, 0.0 }
 0xc21   :  { %v4808_v40 = vpop.eup %3468  ;;  %v2712_v13 = vsel %vm2153_vm14, %v2704_v31, 0.0 }
 0xc22   :  { %2713 = vadd.xlane.f32.xlu0 %v2712_v13  ;;  %v2703_v0 = vsel %vm4211_vm12, %v4808_v40, 0.0  ;;  %v2723_v11 = vsel %vm4215_vm13, %v4808_v40, 0.0 }
 0xc23   :  { %v4811_v58 = vpop.eup %3470  ;;  %v2709_v13 = vsel %vm2153_vm14, %v2703_v0, 0.0  ;;  %v4850_v0 = vsel %vm2112_vm15, 1.0, %v5151_v44 }
 0xc24   :  { %5150 = vst [vmem:[#allocation6_spill] sm:$0xff] %v4811_v58  ;;  %v4816_v56 = vpop.xlane.xlu1 %2395  ;;  %v4818_v57 = vpop.xlane.xlu0 %2398  ;;  %v2705_v8 = vsel %vm4211_vm12, %v4811_v58, 0.0  ;;  %v2415_v23 = vsel %vm4211_vm12, %v2369_v15, %v4850_v0 }
 0xc25   :  { %v2715_v3 = vsel %vm2153_vm14, %v2705_v8, 0.0  ;;  %v2726_v8 = vsel %vm2153_vm14, %v2722_v47, 0.0  ;;  %v2729_v47 = vsel %vm2153_vm14, %v2723_v11, 0.0 }
 0xc26   :  { %2716 = vadd.xlane.f32.xlu1 %v2715_v3  ;;  %2707 = vadd.xlane.f32.xlu0 %v2706_v7  ;;  %v2724_v3 = vsel %vm4215_vm13, %v4799_v19, 0.0 }
 0xc28   :  { %v4831_v9 = vpop.xlane.xlu1 %2401  ;;  %v4833_v31 = vpop.xlane.xlu0 %2404 }
 0xc2a   :  { %2710 = vadd.xlane.f32.xlu1 %v2709_v13  ;;  %2727 = vadd.xlane.f32.xlu0 %v2726_v8  ;;  %v2732_v13 = vsel %vm2153_vm14, %v2724_v3, 0.0  ;;  %v2725_v8 = vsel %vm4215_vm13, %v4811_v58, 0.0  ;;  %v2416_v3 = vsel %vm4211_vm12, %v2372_v60, %v4850_v0  ;;  %v2419_v60 = vsel %vm4211_vm12, %v2381_v37, %v4850_v0 }
 0xc2b   :  { %v2735_v11 = vsel %vm2153_vm14, %v2725_v8, 0.0 }
 0xc2c   :  { %v4843_v7 = vpop.xlane.xlu1 %2407  ;;  %v4845_v59 = vpop.xlane.xlu0 %2410 }
 0xc2e   :  { %2730 = vadd.xlane.f32.xlu1 %v2729_v47  ;;  %2733 = vadd.xlane.f32.xlu0 %v2732_v13  ;;  %v2417_v47 = vsel %vm4211_vm12, %v2375_v22, %v4850_v0 }
 0xc30   :  { %v4860_v21 = vpop.xlane.xlu1 %2413  ;;  %v2449_v19 = vpop.xlane.xlu0 %2448 }
 0xc31   :  { %v2495_v44 = vsel %vm4215_vm13, %v2449_v19, %v2415_v23  ;;  %v2418_v19 = vsel %vm4211_vm12, %v2378_v35, %v4850_v0  ;;  %v2421_v35 = vsel %vm4211_vm12, %v4795_v36, %v4850_v0  ;;  %v2423_v36 = vsel %vm4211_vm12, %v4803_v33, %v4850_v0 }
 0xc32   :  { %3472 = vrcp.f32 %v2495_v44  ;;  %2736 = vadd.xlane.f32.xlu1 %v2735_v11  ;;  %v2424_v33 = vsel %vm4211_vm12, %v4816_v56, %v4850_v0 }
 0xc34   :  { %v2452_v13 = vpop.xlane.xlu1 %2451  ;;  %v2455_v15 = vpop.xlane.xlu0 %2454 }
 0xc35   :  { %v2496_v58 = vsel %vm4215_vm13, %v2452_v13, %v2416_v3  ;;  %v2497_v23 = vsel %vm4215_vm13, %v2455_v15, %v2417_v47 }
 0xc36   :  { %3474 = vrcp.f32 %v2496_v58  ;;  %v2420_v58 = vsel %vm4211_vm12, %v4793_v5, %v4850_v0  ;;  %v2422_v5 = vsel %vm4211_vm12, %v4801_v39, %v4850_v0 }
 0xc37   :  { %3476 = vrcp.f32 %v2497_v23 }
 0xc38   :  { %v2458_v8 = vpop.xlane.xlu1 %2457  ;;  %v2461_v22 = vpop.xlane.xlu0 %2460 }
 0xc39   :  { %v2498_v44 = vsel %vm4215_vm13, %v2458_v8, %v2418_v19  ;;  %v2499_v11 = vsel %vm4215_vm13, %v2461_v22, %v2419_v60 }
 0xc3a   :  { %3478 = vrcp.f32 %v2498_v44 }
 0xc3b   :  { %3480 = vrcp.f32 %v2499_v11  ;;  %v2425_v11 = vsel %vm4211_vm12, %v4818_v57, %v4850_v0  ;;  %v2426_v57 = vsel %vm4211_vm12, %v4831_v9, %v4850_v0 }
 0xc3c   :  { %v2464_v37 = vpop.xlane.xlu1 %2463  ;;  %v2467_v3 = vpop.xlane.xlu0 %2466 }
 0xc3d   :  { %v2500_v47 = vsel %vm4215_vm13, %v2464_v37, %v2420_v58  ;;  %v2501_v13 = vsel %vm4215_vm13, %v2467_v3, %v2421_v35 }
 0xc3e   :  { %3482 = vrcp.f32 %v2500_v47 }
 0xc3f   :  { %v3473_v15 = vpop.eup %3472  ;;  %3484 = vrcp.f32 %v2501_v13 }
 0xc40   :  { %v2512_v23 = vmul.f32 %v3473_v15, %v4550_v24  ;;  %v2470_v19 = vpop.xlane.xlu1 %2469  ;;  %v2473_v60 = vpop.xlane.xlu0 %2472 }
 0xc41   :  { %v2502_v8 = vsel %vm4215_vm13, %v2470_v19, %v2422_v5  ;;  %v2503_v22 = vsel %vm4215_vm13, %v2473_v60, %v2423_v36  ;;  %v2428_v60 = vsel %vm4211_vm12, %v4843_v7, %v4850_v0 }
 0xc42   :  { %v2543_v44 = vsel %vm2112_vm15, %v4223_v32, %v2512_v23  ;;  %3486 = vrcp.f32 %v2502_v8 }
 0xc43   :  { %v3475_v39 = vpop.eup %3474  ;;  %2559 = vst.msk [vmem:[%s5134_s3] sm:$0xff] %vm2153_vm14, %v2543_v44  ;;  %3488 = vrcp.f32 %v2503_v22 }
 0xc44   :  { %v3477_v24 = vpop.eup %3476  ;;  %v2514_v32 = vmul.f32 %v3475_v39, %v4579_v55  ;;  %v2476_v58 = vpop.xlane.xlu1 %2475 }
 0xc45   :  { %v2479_v35 = vpop.xlane.xlu0 %2478  ;;  %v2516_v37 = vmul.f32 %v3477_v24, %v4573_v42  ;;  %v2504_v3 = vsel %vm4215_vm13, %v2476_v58, %v2424_v33  ;;  %v2430_v33 = vsel %vm4211_vm12, %v4860_v21, %v4850_v0 }
 0xc46   :  { %v2505_v47 = vsel %vm4215_vm13, %v2479_v35, %v2425_v11  ;;  %v2544_v56 = vsel %vm2112_vm15, %v4246_v54, %v2514_v32  ;;  %3490 = vrcp.f32 %v2504_v3  ;;  %v2427_v54 = vsel %vm4211_vm12, %v4833_v31, %v4850_v0 }
 0xc47   :  { %v3479_v13 = vpop.eup %3478  ;;  %2560 = vst.msk [vmem:[%s5134_s3 + $0x8] sm:$0xff] %vm2153_vm14, %v2544_v56  ;;  %v2545_v42 = vsel %vm2112_vm15, %v4220_v41, %v2516_v37  ;;  %3492 = vrcp.f32 %v2505_v47 }
 0xc48   :  { %v3481_v55 = vpop.eup %3480  ;;  %2561 = vst.msk [vmem:[%s5134_s3 + $0x10] sm:$0xff] %vm2153_vm14, %v2545_v42  ;;  %v2518_v15 = vmul.f32 %v3479_v13, %v4597_v61  ;;  %v2482_v41 = vpop.xlane.xlu1 %2481 }
 0xc49   :  { %v2485_v5 = vpop.xlane.xlu0 %2484  ;;  %v2520_v36 = vmul.f32 %v3481_v55, %v4615_v1  ;;  %v2506_v23 = vsel %vm4215_vm13, %v2482_v41, %v2426_v57 }
 0xc4a   :  { %v2507_v9 = vsel %vm4215_vm13, %v2485_v5, %v2427_v54  ;;  %v2546_v31 = vsel %vm2112_vm15, %v4235_v28, %v2518_v15  ;;  %3494 = vrcp.f32 %v2506_v23  ;;  %v2429_v28 = vsel %vm4211_vm12, %v4845_v59, %v4850_v0 }
 0xc4b   :  { %v3483_v19 = vpop.eup %3482  ;;  %2562 = vst.msk [vmem:[%s5134_s3 + $0x18] sm:$0xff] %vm2153_vm14, %v2546_v31  ;;  %v2547_v61 = vsel %vm2112_vm15, %v4279_v48, %v2520_v36  ;;  %3496 = vrcp.f32 %v2507_v9 }
 0xc4c   :  { %v3485_v1 = vpop.eup %3484  ;;  %2563 = vst.msk [vmem:[%s5134_s3 + $0x20] sm:$0xff] %vm2153_vm14, %v2547_v61  ;;  %v2522_v8 = vmul.f32 %v3483_v19, %v4631_v14  ;;  %v2488_v48 = vpop.xlane.xlu1 %2487 }
 0xc4d   :  { %v2491_v22 = vpop.xlane.xlu0 %2490  ;;  %v2524_v44 = vmul.f32 %v3485_v1, %v4621_v45  ;;  %v2508_v39 = vsel %vm4215_vm13, %v2488_v48, %v2428_v60 }
 0xc4e   :  { %v2509_v7 = vsel %vm4215_vm13, %v2491_v22, %v2429_v28  ;;  %v2548_v59 = vsel %vm2112_vm15, %v4282_v6, %v2522_v8  ;;  %3498 = vrcp.f32 %v2508_v39  ;;  %v5153_v22 = vld [vmem:[#allocation4_spill] sm:$0xff] }
 0xc4f   :  { %v3487_v24 = vpop.eup %3486  ;;  %2564 = vst.msk [vmem:[%s5134_s3 + $0x28] sm:$0xff] %vm2153_vm14, %v2548_v59  ;;  %v2549_v45 = vsel %vm2112_vm15, %v4257_v26, %v2524_v44  ;;  %3500 = vrcp.f32 %v2509_v7  ;;  %v5156_v59 = vld [vmem:[#allocation3_spill] sm:$0xff] }
 0xc50   :  { %v3489_v14 = vpop.eup %3488  ;;  %2565 = vst.msk [vmem:[%s5134_s3 + $0x30] sm:$0xff] %vm2153_vm14, %v2549_v45  ;;  %v2526_v6 = vmul.f32 %v3487_v24, %v4633_v50  ;;  %v2494_v11 = vpop.xlane.xlu1 %2493 }
 0xc51   :  { %v2528_v32 = vmul.f32 %v3489_v14, %v4637_v34  ;;  %v2510_v26 = vsel %vm4215_vm13, %v2494_v11, %v2430_v33 }
 0xc52   :  { %v2550_v58 = vsel %vm2112_vm15, %v4260_v53, %v2526_v6  ;;  %3502 = vrcp.f32 %v2510_v26 }
 0xc53   :  { %v3491_v35 = vpop.eup %3490  ;;  %2566 = vst.msk [vmem:[%s5134_s3 + $0x38] sm:$0xff] %vm2153_vm14, %v2550_v58  ;;  %v2551_v21 = vsel %vm2112_vm15, %v4323_v63, %v2528_v32 }
 0xc54   :  { %v3493_v50 = vpop.eup %3492  ;;  %2567 = vst.msk [vmem:[%s5134_s3 + $0x40] sm:$0xff] %vm2153_vm14, %v2551_v21  ;;  %v2530_v34 = vmul.f32 %v3491_v35, %v4655_v17 }
 0xc55   :  { %v2532_v53 = vmul.f32 %v3493_v50, %v4647_v29 }
 0xc56   :  { %v2552_v37 = vsel %vm2112_vm15, %v4326_v38, %v2530_v34 }
 0xc57   :  { %v3495_v3 = vpop.eup %3494  ;;  %2568 = vst.msk [vmem:[%s5134_s3 + $0x48] sm:$0xff] %vm2153_vm14, %v2552_v37  ;;  %v2553_v63 = vsel %vm2112_vm15, %v4301_v49, %v2532_v53 }
 0xc58   :  { %v3497_v47 = vpop.eup %3496  ;;  %2569 = vst.msk [vmem:[%s5134_s3 + $0x50] sm:$0xff] %vm2153_vm14, %v2553_v63  ;;  %v2534_v29 = vmul.f32 %v3495_v3, %v4659_v62 }
 0xc59   :  { %v2536_v38 = vmul.f32 %v3497_v47, %v4667_v52 }
 0xc5a   :  { %v2554_v17 = vsel %vm2112_vm15, %v4304_v27, %v2534_v29 }
 0xc5b   :  { %v3499_v56 = vpop.eup %3498  ;;  %2570 = vst.msk [vmem:[%s5134_s3 + $0x58] sm:$0xff] %vm2153_vm14, %v2554_v17  ;;  %v2555_v49 = vsel %vm2112_vm15, %v4367_v51, %v2536_v38 }
 0xc5c   :  { %v3501_v13 = vpop.eup %3500  ;;  %2571 = vst.msk [vmem:[%s5134_s3 + $0x60] sm:$0xff] %vm2153_vm14, %v2555_v49  ;;  %v2538_v62 = vmul.f32 %v3499_v56, %v4679_v43 }
 0xc5d   :  { %v2540_v27 = vmul.f32 %v3501_v13, %v4671_v16 }
 0xc5e   :  { %v2556_v52 = vsel %vm2112_vm15, %v4370_v20, %v2538_v62 }
 0xc5f   :  { %v3503_v42 = vpop.eup %3502  ;;  %2572 = vst.msk [vmem:[%s5134_s3 + $0x68] sm:$0xff] %vm2153_vm14, %v2556_v52  ;;  %v2557_v51 = vsel %vm2112_vm15, %v4345_v10, %v2540_v27 }
 0xc60   :  { %2573 = vst.msk [vmem:[%s5134_s3 + $0x70] sm:$0xff] %vm2153_vm14, %v2557_v51  ;;  %v2542_v16 = vmul.f32 %v3503_v42, %v4689_v2 }
 0xc62   :  { %v2558_v20 = vsel %vm2112_vm15, %v4348_v12, %v2542_v16 }
 0xc63   :  { %2574 = vst.msk [vmem:[%s5134_s3 + $0x78] sm:$0xff] %vm2153_vm14, %v2558_v20 }
 0xcab   :  { %v2714_v43 = vpop.xlane.xlu0 %2713 }
 0xcac   :  { %v2720_v5 = vsel %vm4211_vm12, %v2714_v43, %v4850_v0 }
 0xcaf   :  { %v2717_v55 = vpop.xlane.xlu1 %2716  ;;  %v2708_v57 = vpop.xlane.xlu0 %2707 }
 0xcb0   :  { %v2718_v54 = vsel %vm4211_vm12, %v2708_v57, %v4850_v0  ;;  %v2721_v31 = vsel %vm4211_vm12, %v2717_v55, %v4850_v0 }
 0xcb3   :  { %v2711_v10 = vpop.xlane.xlu1 %2710  ;;  %v2728_v15 = vpop.xlane.xlu0 %2727 }
 0xcb4   :  { %v2738_v2 = vsel %vm4215_vm13, %v2728_v15, %v2718_v54  ;;  %v2719_v12 = vsel %vm4211_vm12, %v2711_v10, %v4850_v0  ;;  %v5152_v0 = vld [vmem:[#allocation5_spill] sm:$0xff] }
 0xcb5   :  { %3504 = vrcp.f32 %v2738_v2 }
 0xcb7   :  { %v2731_v41 = vpop.xlane.xlu1 %2730  ;;  %v2734_v23 = vpop.xlane.xlu0 %2733 }
 0xcb8   :  { %v2739_v36 = vsel %vm4215_vm13, %v2731_v41, %v2719_v12  ;;  %v2740_v9 = vsel %vm4215_vm13, %v2734_v23, %v2720_v5 }
 0xcb9   :  { %3506 = vrcp.f32 %v2739_v36 }
 0xcba   :  { %3508 = vrcp.f32 %v2740_v9 }
 0xcbb   :  { %v2737_v19 = vpop.xlane.xlu1 %2736 }
 0xcbc   :  { %v2741_v61 = vsel %vm4215_vm13, %v2737_v19, %v2721_v31 }
 0xcbd   :  { %3510 = vrcp.f32 %v2741_v61 }
 0xcc2   :  { %v3505_v1 = vpop.eup %3504 }
 0xcc3   :  { %v2743_v60 = vmul.f32 %v3505_v1, %v4797_v25 }
 0xcc5   :  { %v2750_v8 = vsel %vm2112_vm15, %v4493_v30, %v2743_v60  ;;  %v5154_v30 = vld [vmem:[#allocation2_spill] sm:$0xff] }
 0xcc6   :  { %v3507_v28 = vpop.eup %3506  ;;  %2754 = vst.msk [vmem:[%s5135_s4] sm:$0xff] %vm2153_vm14, %v2750_v8 }
 0xcc7   :  { %v3509_v48 = vpop.eup %3508  ;;  %v2745_v46 = vmul.f32 %v3507_v28, %v4808_v40  ;;  %v5155_v40 = vld [vmem:[#allocation6_spill] sm:$0xff] }
 0xcc8   :  { %v2747_v4 = vmul.f32 %v3509_v48, %v5152_v0 }
 0xcc9   :  { %v2751_v44 = vsel %vm2112_vm15, %v5153_v22, %v2745_v46 }
 0xcca   :  { %v3511_v25 = vpop.eup %3510  ;;  %2755 = vst.msk [vmem:[%s5135_s4 + $0x8] sm:$0xff] %vm2153_vm14, %v2751_v44  ;;  %v2752_v39 = vsel %vm2112_vm15, %v5154_v30, %v2747_v4 }
 0xccb   :  { %2756 = vst.msk [vmem:[%s5135_s4 + $0x10] sm:$0xff] %vm2153_vm14, %v2752_v39  ;;  %v2749_v7 = vmul.f32 %v3511_v25, %v5155_v40 }
 0xccd   :  { %v2753_v24 = vsel %vm2112_vm15, %v5156_v59, %v2749_v7 }
 0xcce   :  { %2757 = vst.msk [vmem:[%s5135_s4 + $0x18] sm:$0xff] %vm2153_vm14, %v2753_v24 }

</bundles_post_ra>
